<compile_context>
chip_gen: v7x
topology: tpu7x:2x2x1
jax: 0.10.0
libtpu: 0.0.40
codegen_flags: <defaults>
</compile_context>

<pallas_src>
import functools
import math

import jax
import jax.numpy as jnp
from jax.experimental import pallas as pl
from jax.experimental.pallas import tpu as pltpu

# Model configuration (small, consistent with nn.TransformerEncoderLayer).
D_MODEL = 32
N_HEAD = 4
D_HEAD = D_MODEL // N_HEAD
D_FF = 64
N_LAYERS = 2
EPS = 1e-5  # norm1.eps == norm2.eps (PyTorch default)


def _layer_norm(x, w, b):
    # PyTorch LayerNorm over last dim, biased variance.
    mean = jnp.mean(x, axis=-1, keepdims=True)
    var = jnp.mean((x - mean) ** 2, axis=-1, keepdims=True)
    return (x - mean) * jax.lax.rsqrt(var + EPS) * w + b


# --------------------------- fused encoder kernel ---------------------------

def encoder_stack_kernel(x_ref,
                         wqkv_ref, bqkv_ref, wo_ref, bo_ref,
                         n1w_ref, n1b_ref, n2w_ref, n2b_ref,
                         l1w_ref, l1b_ref, l2w_ref, l2b_ref,
                         o_ref, *, batch, seq):
    """All N_LAYERS encoder layers in one kernel; activation stays on chip."""
    x2 = x_ref[...]                                       # (B*S, D)
    n_layers = wqkv_ref.shape[0]

    for l in range(n_layers):
        # ---- self-attention: ONE fused QKV matmul (scale folded into Wq) ----
        qkv2 = jnp.dot(x2, wqkv_ref[l],
                       preferred_element_type=jnp.float32) + bqkv_ref[l]
        # leading-dim split only (lane dim untouched) -> cheap reshape
        qkv = qkv2.reshape(batch, seq, 3 * D_MODEL)

        attn2 = jnp.zeros((batch * seq, D_MODEL), jnp.float32)
        for h in range(N_HEAD):
            lo = h * D_HEAD
            q_h = qkv[:, :, lo:lo + D_HEAD]
            k_h = qkv[:, :, D_MODEL + lo:D_MODEL + lo + D_HEAD]
            v_h = qkv[:, :, 2 * D_MODEL + lo:2 * D_MODEL + lo + D_HEAD]

            s = jnp.einsum('bqe,bke->bqk', q_h, k_h,
                           preferred_element_type=jnp.float32)
            s = s - jnp.max(s, axis=-1, keepdims=True)
            p = jnp.exp(s)
            p = p / jnp.sum(p, axis=-1, keepdims=True)

            ctx_h = jnp.einsum('bqk,bke->bqe', p, v_h,
                               preferred_element_type=jnp.float32)
            # fold per-head output projection directly into the accumulator
            # (sum_h ctx_h @ Wo_h == concat(ctx) @ Wo), no lane concat needed.
            attn2 = attn2 + jnp.dot(ctx_h.reshape(batch * seq, D_HEAD),
                                    wo_ref[l, h],
                                    preferred_element_type=jnp.float32)
        attn2 = attn2 + bo_ref[l]

        # residual + norm1 (post-norm; dropout identity in eval mode)
        x2 = _layer_norm(x2 + attn2, n1w_ref[l], n1b_ref[l])

        # ---- feed-forward: linear1 -> ReLU -> linear2 (plain 2D matmuls) ----
        h1 = jnp.dot(x2, l1w_ref[l],
                     preferred_element_type=jnp.float32) + l1b_ref[l]
        h1 = jnp.maximum(h1, 0.0)
        ff = jnp.dot(h1, l2w_ref[l],
                     preferred_element_type=jnp.float32) + l2b_ref[l]

        # residual + norm2
        x2 = _layer_norm(x2 + ff, n2w_ref[l], n2b_ref[l])

    o_ref[...] = x2


def transformer_encoder_pallas(x, stacked):
    """x: (B, S, D) float32; stacked: tuple of layer-stacked kernel params."""
    B, S, D = x.shape
    x2 = x.reshape(B * S, D)
    kernel = functools.partial(encoder_stack_kernel, batch=B, seq=S)
    n_in = 1 + len(stacked)
    out2 = pl.pallas_call(
        kernel,
        out_shape=jax.ShapeDtypeStruct((B * S, D), jnp.float32),
        in_specs=[pl.BlockSpec(memory_space=pltpu.MemorySpace.VMEM)] * n_in,
        out_specs=pl.BlockSpec(memory_space=pltpu.MemorySpace.VMEM),
    )(x2, *stacked)
    return out2.reshape(B, S, D)


forward = jax.jit(transformer_encoder_pallas)


# ------------------------- parameter setup (glue) -------------------------

def init_params(key):
    """Deterministic synthetic parameters, PyTorch parameter shapes."""
    layers = []
    for _ in range(N_LAYERS):
        key, *ks = jax.random.split(key, 13)
        in_w = 0.1 * jax.random.normal(ks[0], (3 * D_MODEL, D_MODEL), jnp.float32)
        in_b = 0.05 * jax.random.normal(ks[1], (3 * D_MODEL,), jnp.float32)
        out_w = 0.1 * jax.random.normal(ks[2], (D_MODEL, D_MODEL), jnp.float32)
        out_b = 0.05 * jax.random.normal(ks[3], (D_MODEL,), jnp.float32)
        n1_w = 1.0 + 0.05 * jax.random.normal(ks[4], (D_MODEL,), jnp.float32)
        n1_b = 0.05 * jax.random.normal(ks[5], (D_MODEL,), jnp.float32)
        n2_w = 1.0 + 0.05 * jax.random.normal(ks[6], (D_MODEL,), jnp.float32)
        n2_b = 0.05 * jax.random.normal(ks[7], (D_MODEL,), jnp.float32)
        l1_w = 0.1 * jax.random.normal(ks[8], (D_FF, D_MODEL), jnp.float32)
        l1_b = 0.05 * jax.random.normal(ks[9], (D_FF,), jnp.float32)
        l2_w = 0.1 * jax.random.normal(ks[10], (D_MODEL, D_FF), jnp.float32)
        l2_b = 0.05 * jax.random.normal(ks[11], (D_MODEL,), jnp.float32)
        layers.append((in_w, in_b, out_w, out_b, n1_w, n1_b, n2_w, n2_b,
                       l1_w, l1_b, l2_w, l2_b))
    return layers


def prep_params(layers):
    """One-time transform of PyTorch-shaped params into layer-stacked,
    kernel-ready operands (fused QKV weight, folded 1/sqrt(d_head), per-head
    output-projection slabs, transposed FFN weights)."""
    scale = 1.0 / math.sqrt(D_HEAD)
    acc = [[] for _ in range(12)]
    for p in layers:
        (in_w, in_b, out_w, out_b, n1w, n1b, n2w, n2b,
         l1w, l1b, l2w, l2b) = p
        wq = in_w[0:D_MODEL].T * scale          # scale folded into Q weights
        wk = in_w[D_MODEL:2 * D_MODEL].T
        wv = in_w[2 * D_MODEL:].T
        bq = in_b[0:D_MODEL] * scale
        bk = in_b[D_MODEL:2 * D_MODEL]
        bv = in_b[2 * D_MODEL:]
        vals = (
            jnp.concatenate([wq, wk, wv], axis=1),           # (D, 3D)
            jnp.concatenate([bq, bk, bv]).reshape(1, -1),    # (1, 3D)
            out_w.T.reshape(N_HEAD, D_HEAD, D_MODEL),        # (H, Dh, D)
            out_b.reshape(1, -1),                            # (1, D)
            n1w.reshape(1, -1), n1b.reshape(1, -1),
            n2w.reshape(1, -1), n2b.reshape(1, -1),
            l1w.T, l1b.reshape(1, -1),                       # (D, Dff), (1, Dff)
            l2w.T, l2b.reshape(1, -1),                       # (Dff, D), (1, D)
        )
        for a, v in zip(acc, vals):
            a.append(v)
    return tuple(jnp.stack(a) for a in acc)                  # leading layer axis


# ------------------------- pure-JAX reference -------------------------

def ref_layer(x, p):
    (in_w, in_b, out_w, out_b, n1w, n1b, n2w, n2b, l1w, l1b, l2w, l2b) = p
    B, S, _ = x.shape
    q = x @ in_w[0:D_MODEL].T + in_b[0:D_MODEL]
    k = x @ in_w[D_MODEL:2 * D_MODEL].T + in_b[D_MODEL:2 * D_MODEL]
    v = x @ in_w[2 * D_MODEL:].T + in_b[2 * D_MODEL:]
    q = q.reshape(B, S, N_HEAD, D_HEAD)
    k = k.reshape(B, S, N_HEAD, D_HEAD)
    v = v.reshape(B, S, N_HEAD, D_HEAD)
    s = jnp.einsum('bqhd,bkhd->bhqk', q, k) / math.sqrt(D_HEAD)
    a = jax.nn.softmax(s, axis=-1)
    ctx = jnp.einsum('bhqk,bkhd->bqhd', a, v).reshape(B, S, D_MODEL)
    attn = ctx @ out_w.T + out_b
    x1 = _layer_norm(x + attn, n1w, n1b)
    h = jax.nn.relu(x1 @ l1w.T + l1b)
    ff = h @ l2w.T + l2b
    return _layer_norm(x1 + ff, n2w, n2b)


if __name__ == "__main__":
    B, S = 2, 8
    key = jax.random.PRNGKey(0)
    key, xk = jax.random.split(key)
    src = jax.random.normal(xk, (B, S, D_MODEL), jnp.float32)
    params = init_params(key)

    # One-time weight prep (outside the hot path), then a single fused kernel.
    stacked = prep_params(params)
    out = forward(src, stacked)
    out = jax.block_until_ready(out)

    # Correctness check against a pure-JAX reference of the PyTorch math.
    ref = src
    for p in params:
        ref = ref_layer(ref, p)
    ref = jax.block_until_ready(ref)

    assert out.shape == (B, S, D_MODEL)
    max_err = jnp.max(jnp.abs(out - ref))
    assert jnp.allclose(out, ref, atol=2e-4, rtol=2e-4), (
        f"max abs err {max_err}")
    print("KERNEL_OK")
</pallas_src>

<mosaic_0001>
module attributes {stable_mosaic.version = 11 : i64} {
  func.func @encoder_stack_kernel(%arg0: memref<16x32xf32, #tpu.memory_space<vmem>>, %arg1: memref<2x32x96xf32, #tpu.memory_space<vmem>>, %arg2: memref<2x1x96xf32, #tpu.memory_space<vmem>>, %arg3: memref<2x4x8x32xf32, #tpu.memory_space<vmem>>, %arg4: memref<2x1x32xf32, #tpu.memory_space<vmem>>, %arg5: memref<2x1x32xf32, #tpu.memory_space<vmem>>, %arg6: memref<2x1x32xf32, #tpu.memory_space<vmem>>, %arg7: memref<2x1x32xf32, #tpu.memory_space<vmem>>, %arg8: memref<2x1x32xf32, #tpu.memory_space<vmem>>, %arg9: memref<2x32x64xf32, #tpu.memory_space<vmem>>, %arg10: memref<2x1x64xf32, #tpu.memory_space<vmem>>, %arg11: memref<2x64x32xf32, #tpu.memory_space<vmem>>, %arg12: memref<2x1x32xf32, #tpu.memory_space<vmem>>, %arg13: memref<16x32xf32, #tpu.memory_space<vmem>>) attributes {dimension_semantics = [], scalar_prefetch = 0 : i64, scratch_operands = 0 : i64, tpu.core_type = #tpu.core_type<tc>} {
    %c0 = arith.constant 0 : index
    %c0_0 = arith.constant 0 : index
    %0 = vector.load %arg0[%c0, %c0_0] : memref<16x32xf32, #tpu.memory_space<vmem>>, vector<16x32xf32>
    %c0_1 = arith.constant 0 : index
    %c0_2 = arith.constant 0 : index
    %c0_3 = arith.constant 0 : index
    %1 = vector.load %arg1[%c0_1, %c0_2, %c0_3] : memref<2x32x96xf32, #tpu.memory_space<vmem>>, vector<1x32x96xf32>
    %2 = vector.shape_cast %1 : vector<1x32x96xf32> to vector<32x96xf32>
    %cst = arith.constant dense<0.000000e+00> : vector<16x96xf32>
    %3 = tpu.matmul %0, %2, %cst {dimension_numbers = #tpu.dot_dimension_numbers<[1], [0], [0], [1], [0, 0, 1, 1], [], []>} : vector<16x32xf32>, vector<32x96xf32>, vector<16x96xf32> -> vector<16x96xf32>
    %c0_4 = arith.constant 0 : index
    %c0_5 = arith.constant 0 : index
    %c0_6 = arith.constant 0 : index
    %4 = vector.load %arg2[%c0_4, %c0_5, %c0_6] : memref<2x1x96xf32, #tpu.memory_space<vmem>>, vector<1x1x96xf32>
    %5 = vector.shape_cast %4 : vector<1x1x96xf32> to vector<1x96xf32>
    %6 = vector.broadcast %5 : vector<1x96xf32> to vector<16x96xf32>
    %7 = arith.addf %3, %6 : vector<16x96xf32>
    %8 = vector.shape_cast %7 : vector<16x96xf32> to vector<2x8x96xf32>
    %cst_7 = arith.constant 0.000000e+00 : f32
    %9 = vector.broadcast %cst_7 : f32 to vector<16x32xf32>
    %10 = vector.extract_strided_slice %8 {offsets = [0, 0, 0], sizes = [2, 8, 8], strides = [1, 1, 1]} : vector<2x8x96xf32> to vector<2x8x8xf32>
    %11 = vector.extract_strided_slice %8 {offsets = [0, 0, 32], sizes = [2, 8, 8], strides = [1, 1, 1]} : vector<2x8x96xf32> to vector<2x8x8xf32>
    %12 = vector.extract_strided_slice %8 {offsets = [0, 0, 64], sizes = [2, 8, 8], strides = [1, 1, 1]} : vector<2x8x96xf32> to vector<2x8x8xf32>
    "tpu.trace_start"() <{level = 10 : i32, message = "bqe,bke->bqk"}> : () -> ()
    %cst_8 = arith.constant dense<0.000000e+00> : vector<2x8x8xf32>
    %13 = tpu.matmul %10, %11, %cst_8 {dimension_numbers = #tpu.dot_dimension_numbers<[2], [2], [1], [1], [0, 0, 0, 1, 1, 1], [0], [0]>} : vector<2x8x8xf32>, vector<2x8x8xf32>, vector<2x8x8xf32> -> vector<2x8x8xf32>
    "tpu.trace_stop"() : () -> ()
    %cst_9 = arith.constant dense<0xFF800000> : vector<2x8xf32>
    %14 = vector.multi_reduction <maximumf>, %13, %cst_9 [2] : vector<2x8x8xf32> to vector<2x8xf32>
    %15 = vector.shape_cast %14 : vector<2x8xf32> to vector<2x8x1xf32>
    %16 = vector.broadcast %15 : vector<2x8x1xf32> to vector<2x8x8xf32>
    %17 = arith.subf %13, %16 : vector<2x8x8xf32>
    %18 = math.exp %17 : vector<2x8x8xf32>
    %cst_10 = arith.constant dense<0.000000e+00> : vector<2x8xf32>
    %19 = vector.multi_reduction <add>, %18, %cst_10 [2] : vector<2x8x8xf32> to vector<2x8xf32>
    %20 = vector.shape_cast %19 : vector<2x8xf32> to vector<2x8x1xf32>
    %21 = vector.broadcast %20 : vector<2x8x1xf32> to vector<2x8x8xf32>
    %22 = arith.divf %18, %21 : vector<2x8x8xf32>
    "tpu.trace_start"() <{level = 10 : i32, message = "bqk,bke->bqe"}> : () -> ()
    %cst_11 = arith.constant dense<0.000000e+00> : vector<2x8x8xf32>
    %23 = tpu.matmul %22, %12, %cst_11 {dimension_numbers = #tpu.dot_dimension_numbers<[2], [1], [1], [2], [0, 0, 0, 1, 1, 2], [0], [0]>} : vector<2x8x8xf32>, vector<2x8x8xf32>, vector<2x8x8xf32> -> vector<2x8x8xf32>
    "tpu.trace_stop"() : () -> ()
    %24 = vector.shape_cast %23 : vector<2x8x8xf32> to vector<16x8xf32>
    %c0_12 = arith.constant 0 : index
    %c0_13 = arith.constant 0 : index
    %c0_14 = arith.constant 0 : index
    %c0_15 = arith.constant 0 : index
    %25 = vector.load %arg3[%c0_12, %c0_13, %c0_14, %c0_15] : memref<2x4x8x32xf32, #tpu.memory_space<vmem>>, vector<1x1x8x32xf32>
    %26 = vector.shape_cast %25 : vector<1x1x8x32xf32> to vector<8x32xf32>
    %cst_16 = arith.constant dense<0.000000e+00> : vector<16x32xf32>
    %27 = tpu.matmul %24, %26, %cst_16 {dimension_numbers = #tpu.dot_dimension_numbers<[1], [0], [0], [1], [0, 0, 1, 1], [], []>} : vector<16x8xf32>, vector<8x32xf32>, vector<16x32xf32> -> vector<16x32xf32>
    %28 = arith.addf %9, %27 : vector<16x32xf32>
    %29 = vector.extract_strided_slice %8 {offsets = [0, 0, 8], sizes = [2, 8, 8], strides = [1, 1, 1]} : vector<2x8x96xf32> to vector<2x8x8xf32>
    %30 = vector.extract_strided_slice %8 {offsets = [0, 0, 40], sizes = [2, 8, 8], strides = [1, 1, 1]} : vector<2x8x96xf32> to vector<2x8x8xf32>
    %31 = vector.extract_strided_slice %8 {offsets = [0, 0, 72], sizes = [2, 8, 8], strides = [1, 1, 1]} : vector<2x8x96xf32> to vector<2x8x8xf32>
    "tpu.trace_start"() <{level = 10 : i32, message = "bqe,bke->bqk"}> : () -> ()
    %cst_17 = arith.constant dense<0.000000e+00> : vector<2x8x8xf32>
    %32 = tpu.matmul %29, %30, %cst_17 {dimension_numbers = #tpu.dot_dimension_numbers<[2], [2], [1], [1], [0, 0, 0, 1, 1, 1], [0], [0]>} : vector<2x8x8xf32>, vector<2x8x8xf32>, vector<2x8x8xf32> -> vector<2x8x8xf32>
    "tpu.trace_stop"() : () -> ()
    %cst_18 = arith.constant dense<0xFF800000> : vector<2x8xf32>
    %33 = vector.multi_reduction <maximumf>, %32, %cst_18 [2] : vector<2x8x8xf32> to vector<2x8xf32>
    %34 = vector.shape_cast %33 : vector<2x8xf32> to vector<2x8x1xf32>
    %35 = vector.broadcast %34 : vector<2x8x1xf32> to vector<2x8x8xf32>
    %36 = arith.subf %32, %35 : vector<2x8x8xf32>
    %37 = math.exp %36 : vector<2x8x8xf32>
    %cst_19 = arith.constant dense<0.000000e+00> : vector<2x8xf32>
    %38 = vector.multi_reduction <add>, %37, %cst_19 [2] : vector<2x8x8xf32> to vector<2x8xf32>
    %39 = vector.shape_cast %38 : vector<2x8xf32> to vector<2x8x1xf32>
    %40 = vector.broadcast %39 : vector<2x8x1xf32> to vector<2x8x8xf32>
    %41 = arith.divf %37, %40 : vector<2x8x8xf32>
    "tpu.trace_start"() <{level = 10 : i32, message = "bqk,bke->bqe"}> : () -> ()
    %cst_20 = arith.constant dense<0.000000e+00> : vector<2x8x8xf32>
    %42 = tpu.matmul %41, %31, %cst_20 {dimension_numbers = #tpu.dot_dimension_numbers<[2], [1], [1], [2], [0, 0, 0, 1, 1, 2], [0], [0]>} : vector<2x8x8xf32>, vector<2x8x8xf32>, vector<2x8x8xf32> -> vector<2x8x8xf32>
    "tpu.trace_stop"() : () -> ()
    %43 = vector.shape_cast %42 : vector<2x8x8xf32> to vector<16x8xf32>
    %c0_21 = arith.constant 0 : index
    %c1 = arith.constant 1 : index
    %c0_22 = arith.constant 0 : index
    %c0_23 = arith.constant 0 : index
    %44 = vector.load %arg3[%c0_21, %c1, %c0_22, %c0_23] : memref<2x4x8x32xf32, #tpu.memory_space<vmem>>, vector<1x1x8x32xf32>
    %45 = vector.shape_cast %44 : vector<1x1x8x32xf32> to vector<8x32xf32>
    %cst_24 = arith.constant dense<0.000000e+00> : vector<16x32xf32>
    %46 = tpu.matmul %43, %45, %cst_24 {dimension_numbers = #tpu.dot_dimension_numbers<[1], [0], [0], [1], [0, 0, 1, 1], [], []>} : vector<16x8xf32>, vector<8x32xf32>, vector<16x32xf32> -> vector<16x32xf32>
    %47 = arith.addf %28, %46 : vector<16x32xf32>
    %48 = vector.extract_strided_slice %8 {offsets = [0, 0, 16], sizes = [2, 8, 8], strides = [1, 1, 1]} : vector<2x8x96xf32> to vector<2x8x8xf32>
    %49 = vector.extract_strided_slice %8 {offsets = [0, 0, 48], sizes = [2, 8, 8], strides = [1, 1, 1]} : vector<2x8x96xf32> to vector<2x8x8xf32>
    %50 = vector.extract_strided_slice %8 {offsets = [0, 0, 80], sizes = [2, 8, 8], strides = [1, 1, 1]} : vector<2x8x96xf32> to vector<2x8x8xf32>
    "tpu.trace_start"() <{level = 10 : i32, message = "bqe,bke->bqk"}> : () -> ()
    %cst_25 = arith.constant dense<0.000000e+00> : vector<2x8x8xf32>
    %51 = tpu.matmul %48, %49, %cst_25 {dimension_numbers = #tpu.dot_dimension_numbers<[2], [2], [1], [1], [0, 0, 0, 1, 1, 1], [0], [0]>} : vector<2x8x8xf32>, vector<2x8x8xf32>, vector<2x8x8xf32> -> vector<2x8x8xf32>
    "tpu.trace_stop"() : () -> ()
    %cst_26 = arith.constant dense<0xFF800000> : vector<2x8xf32>
    %52 = vector.multi_reduction <maximumf>, %51, %cst_26 [2] : vector<2x8x8xf32> to vector<2x8xf32>
    %53 = vector.shape_cast %52 : vector<2x8xf32> to vector<2x8x1xf32>
    %54 = vector.broadcast %53 : vector<2x8x1xf32> to vector<2x8x8xf32>
    %55 = arith.subf %51, %54 : vector<2x8x8xf32>
    %56 = math.exp %55 : vector<2x8x8xf32>
    %cst_27 = arith.constant dense<0.000000e+00> : vector<2x8xf32>
    %57 = vector.multi_reduction <add>, %56, %cst_27 [2] : vector<2x8x8xf32> to vector<2x8xf32>
    %58 = vector.shape_cast %57 : vector<2x8xf32> to vector<2x8x1xf32>
    %59 = vector.broadcast %58 : vector<2x8x1xf32> to vector<2x8x8xf32>
    %60 = arith.divf %56, %59 : vector<2x8x8xf32>
    "tpu.trace_start"() <{level = 10 : i32, message = "bqk,bke->bqe"}> : () -> ()
    %cst_28 = arith.constant dense<0.000000e+00> : vector<2x8x8xf32>
    %61 = tpu.matmul %60, %50, %cst_28 {dimension_numbers = #tpu.dot_dimension_numbers<[2], [1], [1], [2], [0, 0, 0, 1, 1, 2], [0], [0]>} : vector<2x8x8xf32>, vector<2x8x8xf32>, vector<2x8x8xf32> -> vector<2x8x8xf32>
    "tpu.trace_stop"() : () -> ()
    %62 = vector.shape_cast %61 : vector<2x8x8xf32> to vector<16x8xf32>
    %c0_29 = arith.constant 0 : index
    %c2 = arith.constant 2 : index
    %c0_30 = arith.constant 0 : index
    %c0_31 = arith.constant 0 : index
    %63 = vector.load %arg3[%c0_29, %c2, %c0_30, %c0_31] : memref<2x4x8x32xf32, #tpu.memory_space<vmem>>, vector<1x1x8x32xf32>
    %64 = vector.shape_cast %63 : vector<1x1x8x32xf32> to vector<8x32xf32>
    %cst_32 = arith.constant dense<0.000000e+00> : vector<16x32xf32>
    %65 = tpu.matmul %62, %64, %cst_32 {dimension_numbers = #tpu.dot_dimension_numbers<[1], [0], [0], [1], [0, 0, 1, 1], [], []>} : vector<16x8xf32>, vector<8x32xf32>, vector<16x32xf32> -> vector<16x32xf32>
    %66 = arith.addf %47, %65 : vector<16x32xf32>
    %67 = vector.extract_strided_slice %8 {offsets = [0, 0, 24], sizes = [2, 8, 8], strides = [1, 1, 1]} : vector<2x8x96xf32> to vector<2x8x8xf32>
    %68 = vector.extract_strided_slice %8 {offsets = [0, 0, 56], sizes = [2, 8, 8], strides = [1, 1, 1]} : vector<2x8x96xf32> to vector<2x8x8xf32>
    %69 = vector.extract_strided_slice %8 {offsets = [0, 0, 88], sizes = [2, 8, 8], strides = [1, 1, 1]} : vector<2x8x96xf32> to vector<2x8x8xf32>
    "tpu.trace_start"() <{level = 10 : i32, message = "bqe,bke->bqk"}> : () -> ()
    %cst_33 = arith.constant dense<0.000000e+00> : vector<2x8x8xf32>
    %70 = tpu.matmul %67, %68, %cst_33 {dimension_numbers = #tpu.dot_dimension_numbers<[2], [2], [1], [1], [0, 0, 0, 1, 1, 1], [0], [0]>} : vector<2x8x8xf32>, vector<2x8x8xf32>, vector<2x8x8xf32> -> vector<2x8x8xf32>
    "tpu.trace_stop"() : () -> ()
    %cst_34 = arith.constant dense<0xFF800000> : vector<2x8xf32>
    %71 = vector.multi_reduction <maximumf>, %70, %cst_34 [2] : vector<2x8x8xf32> to vector<2x8xf32>
    %72 = vector.shape_cast %71 : vector<2x8xf32> to vector<2x8x1xf32>
    %73 = vector.broadcast %72 : vector<2x8x1xf32> to vector<2x8x8xf32>
    %74 = arith.subf %70, %73 : vector<2x8x8xf32>
    %75 = math.exp %74 : vector<2x8x8xf32>
    %cst_35 = arith.constant dense<0.000000e+00> : vector<2x8xf32>
    %76 = vector.multi_reduction <add>, %75, %cst_35 [2] : vector<2x8x8xf32> to vector<2x8xf32>
    %77 = vector.shape_cast %76 : vector<2x8xf32> to vector<2x8x1xf32>
    %78 = vector.broadcast %77 : vector<2x8x1xf32> to vector<2x8x8xf32>
    %79 = arith.divf %75, %78 : vector<2x8x8xf32>
    "tpu.trace_start"() <{level = 10 : i32, message = "bqk,bke->bqe"}> : () -> ()
    %cst_36 = arith.constant dense<0.000000e+00> : vector<2x8x8xf32>
    %80 = tpu.matmul %79, %69, %cst_36 {dimension_numbers = #tpu.dot_dimension_numbers<[2], [1], [1], [2], [0, 0, 0, 1, 1, 2], [0], [0]>} : vector<2x8x8xf32>, vector<2x8x8xf32>, vector<2x8x8xf32> -> vector<2x8x8xf32>
    "tpu.trace_stop"() : () -> ()
    %81 = vector.shape_cast %80 : vector<2x8x8xf32> to vector<16x8xf32>
    %c0_37 = arith.constant 0 : index
    %c3 = arith.constant 3 : index
    %c0_38 = arith.constant 0 : index
    %c0_39 = arith.constant 0 : index
    %82 = vector.load %arg3[%c0_37, %c3, %c0_38, %c0_39] : memref<2x4x8x32xf32, #tpu.memory_space<vmem>>, vector<1x1x8x32xf32>
    %83 = vector.shape_cast %82 : vector<1x1x8x32xf32> to vector<8x32xf32>
    %cst_40 = arith.constant dense<0.000000e+00> : vector<16x32xf32>
    %84 = tpu.matmul %81, %83, %cst_40 {dimension_numbers = #tpu.dot_dimension_numbers<[1], [0], [0], [1], [0, 0, 1, 1], [], []>} : vector<16x8xf32>, vector<8x32xf32>, vector<16x32xf32> -> vector<16x32xf32>
    %85 = arith.addf %66, %84 : vector<16x32xf32>
    %c0_41 = arith.constant 0 : index
    %c0_42 = arith.constant 0 : index
    %c0_43 = arith.constant 0 : index
    %86 = vector.load %arg4[%c0_41, %c0_42, %c0_43] : memref<2x1x32xf32, #tpu.memory_space<vmem>>, vector<1x1x32xf32>
    %87 = vector.shape_cast %86 : vector<1x1x32xf32> to vector<1x32xf32>
    %88 = vector.broadcast %87 : vector<1x32xf32> to vector<16x32xf32>
    %89 = arith.addf %85, %88 : vector<16x32xf32>
    %90 = arith.addf %0, %89 : vector<16x32xf32>
    %c0_44 = arith.constant 0 : index
    %c0_45 = arith.constant 0 : index
    %c0_46 = arith.constant 0 : index
    %91 = vector.load %arg5[%c0_44, %c0_45, %c0_46] : memref<2x1x32xf32, #tpu.memory_space<vmem>>, vector<1x1x32xf32>
    %92 = vector.shape_cast %91 : vector<1x1x32xf32> to vector<1x32xf32>
    %c0_47 = arith.constant 0 : index
    %c0_48 = arith.constant 0 : index
    %c0_49 = arith.constant 0 : index
    %93 = vector.load %arg6[%c0_47, %c0_48, %c0_49] : memref<2x1x32xf32, #tpu.memory_space<vmem>>, vector<1x1x32xf32>
    %94 = vector.shape_cast %93 : vector<1x1x32xf32> to vector<1x32xf32>
    %cst_50 = arith.constant dense<0.000000e+00> : vector<16xf32>
    %95 = vector.multi_reduction <add>, %90, %cst_50 [1] : vector<16x32xf32> to vector<16xf32>
    %96 = vector.shape_cast %95 : vector<16xf32> to vector<16x1xf32>
    %cst_51 = arith.constant 3.200000e+01 : f32
    %97 = vector.broadcast %cst_51 : f32 to vector<16x1xf32>
    %98 = arith.divf %96, %97 : vector<16x1xf32>
    %99 = vector.broadcast %98 : vector<16x1xf32> to vector<16x32xf32>
    %100 = arith.subf %90, %99 : vector<16x32xf32>
    %101 = arith.mulf %100, %100 : vector<16x32xf32>
    %cst_52 = arith.constant dense<0.000000e+00> : vector<16xf32>
    %102 = vector.multi_reduction <add>, %101, %cst_52 [1] : vector<16x32xf32> to vector<16xf32>
    %103 = vector.shape_cast %102 : vector<16xf32> to vector<16x1xf32>
    %cst_53 = arith.constant 3.200000e+01 : f32
    %104 = vector.broadcast %cst_53 : f32 to vector<16x1xf32>
    %105 = arith.divf %103, %104 : vector<16x1xf32>
    %106 = vector.broadcast %98 : vector<16x1xf32> to vector<16x32xf32>
    %107 = arith.subf %90, %106 : vector<16x32xf32>
    %cst_54 = arith.constant 9.99999974E-6 : f32
    %108 = vector.broadcast %cst_54 : f32 to vector<16x1xf32>
    %109 = arith.addf %105, %108 : vector<16x1xf32>
    %110 = math.rsqrt %109 : vector<16x1xf32>
    %111 = vector.broadcast %110 : vector<16x1xf32> to vector<16x32xf32>
    %112 = arith.mulf %107, %111 : vector<16x32xf32>
    %113 = vector.broadcast %92 : vector<1x32xf32> to vector<16x32xf32>
    %114 = arith.mulf %112, %113 : vector<16x32xf32>
    %115 = vector.broadcast %94 : vector<1x32xf32> to vector<16x32xf32>
    %116 = arith.addf %114, %115 : vector<16x32xf32>
    %c0_55 = arith.constant 0 : index
    %c0_56 = arith.constant 0 : index
    %c0_57 = arith.constant 0 : index
    %117 = vector.load %arg9[%c0_55, %c0_56, %c0_57] : memref<2x32x64xf32, #tpu.memory_space<vmem>>, vector<1x32x64xf32>
    %118 = vector.shape_cast %117 : vector<1x32x64xf32> to vector<32x64xf32>
    %cst_58 = arith.constant dense<0.000000e+00> : vector<16x64xf32>
    %119 = tpu.matmul %116, %118, %cst_58 {dimension_numbers = #tpu.dot_dimension_numbers<[1], [0], [0], [1], [0, 0, 1, 1], [], []>} : vector<16x32xf32>, vector<32x64xf32>, vector<16x64xf32> -> vector<16x64xf32>
    %c0_59 = arith.constant 0 : index
    %c0_60 = arith.constant 0 : index
    %c0_61 = arith.constant 0 : index
    %120 = vector.load %arg10[%c0_59, %c0_60, %c0_61] : memref<2x1x64xf32, #tpu.memory_space<vmem>>, vector<1x1x64xf32>
    %121 = vector.shape_cast %120 : vector<1x1x64xf32> to vector<1x64xf32>
    %122 = vector.broadcast %121 : vector<1x64xf32> to vector<16x64xf32>
    %123 = arith.addf %119, %122 : vector<16x64xf32>
    %cst_62 = arith.constant 0.000000e+00 : f32
    %124 = vector.broadcast %cst_62 : f32 to vector<16x64xf32>
    %125 = arith.maximumf %123, %124 : vector<16x64xf32>
    %c0_63 = arith.constant 0 : index
    %c0_64 = arith.constant 0 : index
    %c0_65 = arith.constant 0 : index
    %126 = vector.load %arg11[%c0_63, %c0_64, %c0_65] : memref<2x64x32xf32, #tpu.memory_space<vmem>>, vector<1x64x32xf32>
    %127 = vector.shape_cast %126 : vector<1x64x32xf32> to vector<64x32xf32>
    %cst_66 = arith.constant dense<0.000000e+00> : vector<16x32xf32>
    %128 = tpu.matmul %125, %127, %cst_66 {dimension_numbers = #tpu.dot_dimension_numbers<[1], [0], [0], [1], [0, 0, 1, 1], [], []>} : vector<16x64xf32>, vector<64x32xf32>, vector<16x32xf32> -> vector<16x32xf32>
    %c0_67 = arith.constant 0 : index
    %c0_68 = arith.constant 0 : index
    %c0_69 = arith.constant 0 : index
    %129 = vector.load %arg12[%c0_67, %c0_68, %c0_69] : memref<2x1x32xf32, #tpu.memory_space<vmem>>, vector<1x1x32xf32>
    %130 = vector.shape_cast %129 : vector<1x1x32xf32> to vector<1x32xf32>
    %131 = vector.broadcast %130 : vector<1x32xf32> to vector<16x32xf32>
    %132 = arith.addf %128, %131 : vector<16x32xf32>
    %133 = arith.addf %116, %132 : vector<16x32xf32>
    %c0_70 = arith.constant 0 : index
    %c0_71 = arith.constant 0 : index
    %c0_72 = arith.constant 0 : index
    %134 = vector.load %arg7[%c0_70, %c0_71, %c0_72] : memref<2x1x32xf32, #tpu.memory_space<vmem>>, vector<1x1x32xf32>
    %135 = vector.shape_cast %134 : vector<1x1x32xf32> to vector<1x32xf32>
    %c0_73 = arith.constant 0 : index
    %c0_74 = arith.constant 0 : index
    %c0_75 = arith.constant 0 : index
    %136 = vector.load %arg8[%c0_73, %c0_74, %c0_75] : memref<2x1x32xf32, #tpu.memory_space<vmem>>, vector<1x1x32xf32>
    %137 = vector.shape_cast %136 : vector<1x1x32xf32> to vector<1x32xf32>
    %cst_76 = arith.constant dense<0.000000e+00> : vector<16xf32>
    %138 = vector.multi_reduction <add>, %133, %cst_76 [1] : vector<16x32xf32> to vector<16xf32>
    %139 = vector.shape_cast %138 : vector<16xf32> to vector<16x1xf32>
    %cst_77 = arith.constant 3.200000e+01 : f32
    %140 = vector.broadcast %cst_77 : f32 to vector<16x1xf32>
    %141 = arith.divf %139, %140 : vector<16x1xf32>
    %142 = vector.broadcast %141 : vector<16x1xf32> to vector<16x32xf32>
    %143 = arith.subf %133, %142 : vector<16x32xf32>
    %144 = arith.mulf %143, %143 : vector<16x32xf32>
    %cst_78 = arith.constant dense<0.000000e+00> : vector<16xf32>
    %145 = vector.multi_reduction <add>, %144, %cst_78 [1] : vector<16x32xf32> to vector<16xf32>
    %146 = vector.shape_cast %145 : vector<16xf32> to vector<16x1xf32>
    %cst_79 = arith.constant 3.200000e+01 : f32
    %147 = vector.broadcast %cst_79 : f32 to vector<16x1xf32>
    %148 = arith.divf %146, %147 : vector<16x1xf32>
    %149 = vector.broadcast %141 : vector<16x1xf32> to vector<16x32xf32>
    %150 = arith.subf %133, %149 : vector<16x32xf32>
    %cst_80 = arith.constant 9.99999974E-6 : f32
    %151 = vector.broadcast %cst_80 : f32 to vector<16x1xf32>
    %152 = arith.addf %148, %151 : vector<16x1xf32>
    %153 = math.rsqrt %152 : vector<16x1xf32>
    %154 = vector.broadcast %153 : vector<16x1xf32> to vector<16x32xf32>
    %155 = arith.mulf %150, %154 : vector<16x32xf32>
    %156 = vector.broadcast %135 : vector<1x32xf32> to vector<16x32xf32>
    %157 = arith.mulf %155, %156 : vector<16x32xf32>
    %158 = vector.broadcast %137 : vector<1x32xf32> to vector<16x32xf32>
    %159 = arith.addf %157, %158 : vector<16x32xf32>
    %c1_81 = arith.constant 1 : index
    %c0_82 = arith.constant 0 : index
    %c0_83 = arith.constant 0 : index
    %160 = vector.load %arg1[%c1_81, %c0_82, %c0_83] : memref<2x32x96xf32, #tpu.memory_space<vmem>>, vector<1x32x96xf32>
    %161 = vector.shape_cast %160 : vector<1x32x96xf32> to vector<32x96xf32>
    %cst_84 = arith.constant dense<0.000000e+00> : vector<16x96xf32>
    %162 = tpu.matmul %159, %161, %cst_84 {dimension_numbers = #tpu.dot_dimension_numbers<[1], [0], [0], [1], [0, 0, 1, 1], [], []>} : vector<16x32xf32>, vector<32x96xf32>, vector<16x96xf32> -> vector<16x96xf32>
    %c1_85 = arith.constant 1 : index
    %c0_86 = arith.constant 0 : index
    %c0_87 = arith.constant 0 : index
    %163 = vector.load %arg2[%c1_85, %c0_86, %c0_87] : memref<2x1x96xf32, #tpu.memory_space<vmem>>, vector<1x1x96xf32>
    %164 = vector.shape_cast %163 : vector<1x1x96xf32> to vector<1x96xf32>
    %165 = vector.broadcast %164 : vector<1x96xf32> to vector<16x96xf32>
    %166 = arith.addf %162, %165 : vector<16x96xf32>
    %167 = vector.shape_cast %166 : vector<16x96xf32> to vector<2x8x96xf32>
    %cst_88 = arith.constant 0.000000e+00 : f32
    %168 = vector.broadcast %cst_88 : f32 to vector<16x32xf32>
    %169 = vector.extract_strided_slice %167 {offsets = [0, 0, 0], sizes = [2, 8, 8], strides = [1, 1, 1]} : vector<2x8x96xf32> to vector<2x8x8xf32>
    %170 = vector.extract_strided_slice %167 {offsets = [0, 0, 32], sizes = [2, 8, 8], strides = [1, 1, 1]} : vector<2x8x96xf32> to vector<2x8x8xf32>
    %171 = vector.extract_strided_slice %167 {offsets = [0, 0, 64], sizes = [2, 8, 8], strides = [1, 1, 1]} : vector<2x8x96xf32> to vector<2x8x8xf32>
    "tpu.trace_start"() <{level = 10 : i32, message = "bqe,bke->bqk"}> : () -> ()
    %cst_89 = arith.constant dense<0.000000e+00> : vector<2x8x8xf32>
    %172 = tpu.matmul %169, %170, %cst_89 {dimension_numbers = #tpu.dot_dimension_numbers<[2], [2], [1], [1], [0, 0, 0, 1, 1, 1], [0], [0]>} : vector<2x8x8xf32>, vector<2x8x8xf32>, vector<2x8x8xf32> -> vector<2x8x8xf32>
    "tpu.trace_stop"() : () -> ()
    %cst_90 = arith.constant dense<0xFF800000> : vector<2x8xf32>
    %173 = vector.multi_reduction <maximumf>, %172, %cst_90 [2] : vector<2x8x8xf32> to vector<2x8xf32>
    %174 = vector.shape_cast %173 : vector<2x8xf32> to vector<2x8x1xf32>
    %175 = vector.broadcast %174 : vector<2x8x1xf32> to vector<2x8x8xf32>
    %176 = arith.subf %172, %175 : vector<2x8x8xf32>
    %177 = math.exp %176 : vector<2x8x8xf32>
    %cst_91 = arith.constant dense<0.000000e+00> : vector<2x8xf32>
    %178 = vector.multi_reduction <add>, %177, %cst_91 [2] : vector<2x8x8xf32> to vector<2x8xf32>
    %179 = vector.shape_cast %178 : vector<2x8xf32> to vector<2x8x1xf32>
    %180 = vector.broadcast %179 : vector<2x8x1xf32> to vector<2x8x8xf32>
    %181 = arith.divf %177, %180 : vector<2x8x8xf32>
    "tpu.trace_start"() <{level = 10 : i32, message = "bqk,bke->bqe"}> : () -> ()
    %cst_92 = arith.constant dense<0.000000e+00> : vector<2x8x8xf32>
    %182 = tpu.matmul %181, %171, %cst_92 {dimension_numbers = #tpu.dot_dimension_numbers<[2], [1], [1], [2], [0, 0, 0, 1, 1, 2], [0], [0]>} : vector<2x8x8xf32>, vector<2x8x8xf32>, vector<2x8x8xf32> -> vector<2x8x8xf32>
    "tpu.trace_stop"() : () -> ()
    %183 = vector.shape_cast %182 : vector<2x8x8xf32> to vector<16x8xf32>
    %c1_93 = arith.constant 1 : index
    %c0_94 = arith.constant 0 : index
    %c0_95 = arith.constant 0 : index
    %c0_96 = arith.constant 0 : index
    %184 = vector.load %arg3[%c1_93, %c0_94, %c0_95, %c0_96] : memref<2x4x8x32xf32, #tpu.memory_space<vmem>>, vector<1x1x8x32xf32>
    %185 = vector.shape_cast %184 : vector<1x1x8x32xf32> to vector<8x32xf32>
    %cst_97 = arith.constant dense<0.000000e+00> : vector<16x32xf32>
    %186 = tpu.matmul %183, %185, %cst_97 {dimension_numbers = #tpu.dot_dimension_numbers<[1], [0], [0], [1], [0, 0, 1, 1], [], []>} : vector<16x8xf32>, vector<8x32xf32>, vector<16x32xf32> -> vector<16x32xf32>
    %187 = arith.addf %168, %186 : vector<16x32xf32>
    %188 = vector.extract_strided_slice %167 {offsets = [0, 0, 8], sizes = [2, 8, 8], strides = [1, 1, 1]} : vector<2x8x96xf32> to vector<2x8x8xf32>
    %189 = vector.extract_strided_slice %167 {offsets = [0, 0, 40], sizes = [2, 8, 8], strides = [1, 1, 1]} : vector<2x8x96xf32> to vector<2x8x8xf32>
    %190 = vector.extract_strided_slice %167 {offsets = [0, 0, 72], sizes = [2, 8, 8], strides = [1, 1, 1]} : vector<2x8x96xf32> to vector<2x8x8xf32>
    "tpu.trace_start"() <{level = 10 : i32, message = "bqe,bke->bqk"}> : () -> ()
    %cst_98 = arith.constant dense<0.000000e+00> : vector<2x8x8xf32>
    %191 = tpu.matmul %188, %189, %cst_98 {dimension_numbers = #tpu.dot_dimension_numbers<[2], [2], [1], [1], [0, 0, 0, 1, 1, 1], [0], [0]>} : vector<2x8x8xf32>, vector<2x8x8xf32>, vector<2x8x8xf32> -> vector<2x8x8xf32>
    "tpu.trace_stop"() : () -> ()
    %cst_99 = arith.constant dense<0xFF800000> : vector<2x8xf32>
    %192 = vector.multi_reduction <maximumf>, %191, %cst_99 [2] : vector<2x8x8xf32> to vector<2x8xf32>
    %193 = vector.shape_cast %192 : vector<2x8xf32> to vector<2x8x1xf32>
    %194 = vector.broadcast %193 : vector<2x8x1xf32> to vector<2x8x8xf32>
    %195 = arith.subf %191, %194 : vector<2x8x8xf32>
    %196 = math.exp %195 : vector<2x8x8xf32>
    %cst_100 = arith.constant dense<0.000000e+00> : vector<2x8xf32>
    %197 = vector.multi_reduction <add>, %196, %cst_100 [2] : vector<2x8x8xf32> to vector<2x8xf32>
    %198 = vector.shape_cast %197 : vector<2x8xf32> to vector<2x8x1xf32>
    %199 = vector.broadcast %198 : vector<2x8x1xf32> to vector<2x8x8xf32>
    %200 = arith.divf %196, %199 : vector<2x8x8xf32>
    "tpu.trace_start"() <{level = 10 : i32, message = "bqk,bke->bqe"}> : () -> ()
    %cst_101 = arith.constant dense<0.000000e+00> : vector<2x8x8xf32>
    %201 = tpu.matmul %200, %190, %cst_101 {dimension_numbers = #tpu.dot_dimension_numbers<[2], [1], [1], [2], [0, 0, 0, 1, 1, 2], [0], [0]>} : vector<2x8x8xf32>, vector<2x8x8xf32>, vector<2x8x8xf32> -> vector<2x8x8xf32>
    "tpu.trace_stop"() : () -> ()
    %202 = vector.shape_cast %201 : vector<2x8x8xf32> to vector<16x8xf32>
    %c1_102 = arith.constant 1 : index
    %c1_103 = arith.constant 1 : index
    %c0_104 = arith.constant 0 : index
    %c0_105 = arith.constant 0 : index
    %203 = vector.load %arg3[%c1_102, %c1_103, %c0_104, %c0_105] : memref<2x4x8x32xf32, #tpu.memory_space<vmem>>, vector<1x1x8x32xf32>
    %204 = vector.shape_cast %203 : vector<1x1x8x32xf32> to vector<8x32xf32>
    %cst_106 = arith.constant dense<0.000000e+00> : vector<16x32xf32>
    %205 = tpu.matmul %202, %204, %cst_106 {dimension_numbers = #tpu.dot_dimension_numbers<[1], [0], [0], [1], [0, 0, 1, 1], [], []>} : vector<16x8xf32>, vector<8x32xf32>, vector<16x32xf32> -> vector<16x32xf32>
    %206 = arith.addf %187, %205 : vector<16x32xf32>
    %207 = vector.extract_strided_slice %167 {offsets = [0, 0, 16], sizes = [2, 8, 8], strides = [1, 1, 1]} : vector<2x8x96xf32> to vector<2x8x8xf32>
    %208 = vector.extract_strided_slice %167 {offsets = [0, 0, 48], sizes = [2, 8, 8], strides = [1, 1, 1]} : vector<2x8x96xf32> to vector<2x8x8xf32>
    %209 = vector.extract_strided_slice %167 {offsets = [0, 0, 80], sizes = [2, 8, 8], strides = [1, 1, 1]} : vector<2x8x96xf32> to vector<2x8x8xf32>
    "tpu.trace_start"() <{level = 10 : i32, message = "bqe,bke->bqk"}> : () -> ()
    %cst_107 = arith.constant dense<0.000000e+00> : vector<2x8x8xf32>
    %210 = tpu.matmul %207, %208, %cst_107 {dimension_numbers = #tpu.dot_dimension_numbers<[2], [2], [1], [1], [0, 0, 0, 1, 1, 1], [0], [0]>} : vector<2x8x8xf32>, vector<2x8x8xf32>, vector<2x8x8xf32> -> vector<2x8x8xf32>
    "tpu.trace_stop"() : () -> ()
    %cst_108 = arith.constant dense<0xFF800000> : vector<2x8xf32>
    %211 = vector.multi_reduction <maximumf>, %210, %cst_108 [2] : vector<2x8x8xf32> to vector<2x8xf32>
    %212 = vector.shape_cast %211 : vector<2x8xf32> to vector<2x8x1xf32>
    %213 = vector.broadcast %212 : vector<2x8x1xf32> to vector<2x8x8xf32>
    %214 = arith.subf %210, %213 : vector<2x8x8xf32>
    %215 = math.exp %214 : vector<2x8x8xf32>
    %cst_109 = arith.constant dense<0.000000e+00> : vector<2x8xf32>
    %216 = vector.multi_reduction <add>, %215, %cst_109 [2] : vector<2x8x8xf32> to vector<2x8xf32>
    %217 = vector.shape_cast %216 : vector<2x8xf32> to vector<2x8x1xf32>
    %218 = vector.broadcast %217 : vector<2x8x1xf32> to vector<2x8x8xf32>
    %219 = arith.divf %215, %218 : vector<2x8x8xf32>
    "tpu.trace_start"() <{level = 10 : i32, message = "bqk,bke->bqe"}> : () -> ()
    %cst_110 = arith.constant dense<0.000000e+00> : vector<2x8x8xf32>
    %220 = tpu.matmul %219, %209, %cst_110 {dimension_numbers = #tpu.dot_dimension_numbers<[2], [1], [1], [2], [0, 0, 0, 1, 1, 2], [0], [0]>} : vector<2x8x8xf32>, vector<2x8x8xf32>, vector<2x8x8xf32> -> vector<2x8x8xf32>
    "tpu.trace_stop"() : () -> ()
    %221 = vector.shape_cast %220 : vector<2x8x8xf32> to vector<16x8xf32>
    %c1_111 = arith.constant 1 : index
    %c2_112 = arith.constant 2 : index
    %c0_113 = arith.constant 0 : index
    %c0_114 = arith.constant 0 : index
    %222 = vector.load %arg3[%c1_111, %c2_112, %c0_113, %c0_114] : memref<2x4x8x32xf32, #tpu.memory_space<vmem>>, vector<1x1x8x32xf32>
    %223 = vector.shape_cast %222 : vector<1x1x8x32xf32> to vector<8x32xf32>
    %cst_115 = arith.constant dense<0.000000e+00> : vector<16x32xf32>
    %224 = tpu.matmul %221, %223, %cst_115 {dimension_numbers = #tpu.dot_dimension_numbers<[1], [0], [0], [1], [0, 0, 1, 1], [], []>} : vector<16x8xf32>, vector<8x32xf32>, vector<16x32xf32> -> vector<16x32xf32>
    %225 = arith.addf %206, %224 : vector<16x32xf32>
    %226 = vector.extract_strided_slice %167 {offsets = [0, 0, 24], sizes = [2, 8, 8], strides = [1, 1, 1]} : vector<2x8x96xf32> to vector<2x8x8xf32>
    %227 = vector.extract_strided_slice %167 {offsets = [0, 0, 56], sizes = [2, 8, 8], strides = [1, 1, 1]} : vector<2x8x96xf32> to vector<2x8x8xf32>
    %228 = vector.extract_strided_slice %167 {offsets = [0, 0, 88], sizes = [2, 8, 8], strides = [1, 1, 1]} : vector<2x8x96xf32> to vector<2x8x8xf32>
    "tpu.trace_start"() <{level = 10 : i32, message = "bqe,bke->bqk"}> : () -> ()
    %cst_116 = arith.constant dense<0.000000e+00> : vector<2x8x8xf32>
    %229 = tpu.matmul %226, %227, %cst_116 {dimension_numbers = #tpu.dot_dimension_numbers<[2], [2], [1], [1], [0, 0, 0, 1, 1, 1], [0], [0]>} : vector<2x8x8xf32>, vector<2x8x8xf32>, vector<2x8x8xf32> -> vector<2x8x8xf32>
    "tpu.trace_stop"() : () -> ()
    %cst_117 = arith.constant dense<0xFF800000> : vector<2x8xf32>
    %230 = vector.multi_reduction <maximumf>, %229, %cst_117 [2] : vector<2x8x8xf32> to vector<2x8xf32>
    %231 = vector.shape_cast %230 : vector<2x8xf32> to vector<2x8x1xf32>
    %232 = vector.broadcast %231 : vector<2x8x1xf32> to vector<2x8x8xf32>
    %233 = arith.subf %229, %232 : vector<2x8x8xf32>
    %234 = math.exp %233 : vector<2x8x8xf32>
    %cst_118 = arith.constant dense<0.000000e+00> : vector<2x8xf32>
    %235 = vector.multi_reduction <add>, %234, %cst_118 [2] : vector<2x8x8xf32> to vector<2x8xf32>
    %236 = vector.shape_cast %235 : vector<2x8xf32> to vector<2x8x1xf32>
    %237 = vector.broadcast %236 : vector<2x8x1xf32> to vector<2x8x8xf32>
    %238 = arith.divf %234, %237 : vector<2x8x8xf32>
    "tpu.trace_start"() <{level = 10 : i32, message = "bqk,bke->bqe"}> : () -> ()
    %cst_119 = arith.constant dense<0.000000e+00> : vector<2x8x8xf32>
    %239 = tpu.matmul %238, %228, %cst_119 {dimension_numbers = #tpu.dot_dimension_numbers<[2], [1], [1], [2], [0, 0, 0, 1, 1, 2], [0], [0]>} : vector<2x8x8xf32>, vector<2x8x8xf32>, vector<2x8x8xf32> -> vector<2x8x8xf32>
    "tpu.trace_stop"() : () -> ()
    %240 = vector.shape_cast %239 : vector<2x8x8xf32> to vector<16x8xf32>
    %c1_120 = arith.constant 1 : index
    %c3_121 = arith.constant 3 : index
    %c0_122 = arith.constant 0 : index
    %c0_123 = arith.constant 0 : index
    %241 = vector.load %arg3[%c1_120, %c3_121, %c0_122, %c0_123] : memref<2x4x8x32xf32, #tpu.memory_space<vmem>>, vector<1x1x8x32xf32>
    %242 = vector.shape_cast %241 : vector<1x1x8x32xf32> to vector<8x32xf32>
    %cst_124 = arith.constant dense<0.000000e+00> : vector<16x32xf32>
    %243 = tpu.matmul %240, %242, %cst_124 {dimension_numbers = #tpu.dot_dimension_numbers<[1], [0], [0], [1], [0, 0, 1, 1], [], []>} : vector<16x8xf32>, vector<8x32xf32>, vector<16x32xf32> -> vector<16x32xf32>
    %244 = arith.addf %225, %243 : vector<16x32xf32>
    %c1_125 = arith.constant 1 : index
    %c0_126 = arith.constant 0 : index
    %c0_127 = arith.constant 0 : index
    %245 = vector.load %arg4[%c1_125, %c0_126, %c0_127] : memref<2x1x32xf32, #tpu.memory_space<vmem>>, vector<1x1x32xf32>
    %246 = vector.shape_cast %245 : vector<1x1x32xf32> to vector<1x32xf32>
    %247 = vector.broadcast %246 : vector<1x32xf32> to vector<16x32xf32>
    %248 = arith.addf %244, %247 : vector<16x32xf32>
    %249 = arith.addf %159, %248 : vector<16x32xf32>
    %c1_128 = arith.constant 1 : index
    %c0_129 = arith.constant 0 : index
    %c0_130 = arith.constant 0 : index
    %250 = vector.load %arg5[%c1_128, %c0_129, %c0_130] : memref<2x1x32xf32, #tpu.memory_space<vmem>>, vector<1x1x32xf32>
    %251 = vector.shape_cast %250 : vector<1x1x32xf32> to vector<1x32xf32>
    %c1_131 = arith.constant 1 : index
    %c0_132 = arith.constant 0 : index
    %c0_133 = arith.constant 0 : index
    %252 = vector.load %arg6[%c1_131, %c0_132, %c0_133] : memref<2x1x32xf32, #tpu.memory_space<vmem>>, vector<1x1x32xf32>
    %253 = vector.shape_cast %252 : vector<1x1x32xf32> to vector<1x32xf32>
    %cst_134 = arith.constant dense<0.000000e+00> : vector<16xf32>
    %254 = vector.multi_reduction <add>, %249, %cst_134 [1] : vector<16x32xf32> to vector<16xf32>
    %255 = vector.shape_cast %254 : vector<16xf32> to vector<16x1xf32>
    %cst_135 = arith.constant 3.200000e+01 : f32
    %256 = vector.broadcast %cst_135 : f32 to vector<16x1xf32>
    %257 = arith.divf %255, %256 : vector<16x1xf32>
    %258 = vector.broadcast %257 : vector<16x1xf32> to vector<16x32xf32>
    %259 = arith.subf %249, %258 : vector<16x32xf32>
    %260 = arith.mulf %259, %259 : vector<16x32xf32>
    %cst_136 = arith.constant dense<0.000000e+00> : vector<16xf32>
    %261 = vector.multi_reduction <add>, %260, %cst_136 [1] : vector<16x32xf32> to vector<16xf32>
    %262 = vector.shape_cast %261 : vector<16xf32> to vector<16x1xf32>
    %cst_137 = arith.constant 3.200000e+01 : f32
    %263 = vector.broadcast %cst_137 : f32 to vector<16x1xf32>
    %264 = arith.divf %262, %263 : vector<16x1xf32>
    %265 = vector.broadcast %257 : vector<16x1xf32> to vector<16x32xf32>
    %266 = arith.subf %249, %265 : vector<16x32xf32>
    %cst_138 = arith.constant 9.99999974E-6 : f32
    %267 = vector.broadcast %cst_138 : f32 to vector<16x1xf32>
    %268 = arith.addf %264, %267 : vector<16x1xf32>
    %269 = math.rsqrt %268 : vector<16x1xf32>
    %270 = vector.broadcast %269 : vector<16x1xf32> to vector<16x32xf32>
    %271 = arith.mulf %266, %270 : vector<16x32xf32>
    %272 = vector.broadcast %251 : vector<1x32xf32> to vector<16x32xf32>
    %273 = arith.mulf %271, %272 : vector<16x32xf32>
    %274 = vector.broadcast %253 : vector<1x32xf32> to vector<16x32xf32>
    %275 = arith.addf %273, %274 : vector<16x32xf32>
    %c1_139 = arith.constant 1 : index
    %c0_140 = arith.constant 0 : index
    %c0_141 = arith.constant 0 : index
    %276 = vector.load %arg9[%c1_139, %c0_140, %c0_141] : memref<2x32x64xf32, #tpu.memory_space<vmem>>, vector<1x32x64xf32>
    %277 = vector.shape_cast %276 : vector<1x32x64xf32> to vector<32x64xf32>
    %cst_142 = arith.constant dense<0.000000e+00> : vector<16x64xf32>
    %278 = tpu.matmul %275, %277, %cst_142 {dimension_numbers = #tpu.dot_dimension_numbers<[1], [0], [0], [1], [0, 0, 1, 1], [], []>} : vector<16x32xf32>, vector<32x64xf32>, vector<16x64xf32> -> vector<16x64xf32>
    %c1_143 = arith.constant 1 : index
    %c0_144 = arith.constant 0 : index
    %c0_145 = arith.constant 0 : index
    %279 = vector.load %arg10[%c1_143, %c0_144, %c0_145] : memref<2x1x64xf32, #tpu.memory_space<vmem>>, vector<1x1x64xf32>
    %280 = vector.shape_cast %279 : vector<1x1x64xf32> to vector<1x64xf32>
    %281 = vector.broadcast %280 : vector<1x64xf32> to vector<16x64xf32>
    %282 = arith.addf %278, %281 : vector<16x64xf32>
    %cst_146 = arith.constant 0.000000e+00 : f32
    %283 = vector.broadcast %cst_146 : f32 to vector<16x64xf32>
    %284 = arith.maximumf %282, %283 : vector<16x64xf32>
    %c1_147 = arith.constant 1 : index
    %c0_148 = arith.constant 0 : index
    %c0_149 = arith.constant 0 : index
    %285 = vector.load %arg11[%c1_147, %c0_148, %c0_149] : memref<2x64x32xf32, #tpu.memory_space<vmem>>, vector<1x64x32xf32>
    %286 = vector.shape_cast %285 : vector<1x64x32xf32> to vector<64x32xf32>
    %cst_150 = arith.constant dense<0.000000e+00> : vector<16x32xf32>
    %287 = tpu.matmul %284, %286, %cst_150 {dimension_numbers = #tpu.dot_dimension_numbers<[1], [0], [0], [1], [0, 0, 1, 1], [], []>} : vector<16x64xf32>, vector<64x32xf32>, vector<16x32xf32> -> vector<16x32xf32>
    %c1_151 = arith.constant 1 : index
    %c0_152 = arith.constant 0 : index
    %c0_153 = arith.constant 0 : index
    %288 = vector.load %arg12[%c1_151, %c0_152, %c0_153] : memref<2x1x32xf32, #tpu.memory_space<vmem>>, vector<1x1x32xf32>
    %289 = vector.shape_cast %288 : vector<1x1x32xf32> to vector<1x32xf32>
    %290 = vector.broadcast %289 : vector<1x32xf32> to vector<16x32xf32>
    %291 = arith.addf %287, %290 : vector<16x32xf32>
    %292 = arith.addf %275, %291 : vector<16x32xf32>
    %c1_154 = arith.constant 1 : index
    %c0_155 = arith.constant 0 : index
    %c0_156 = arith.constant 0 : index
    %293 = vector.load %arg7[%c1_154, %c0_155, %c0_156] : memref<2x1x32xf32, #tpu.memory_space<vmem>>, vector<1x1x32xf32>
    %294 = vector.shape_cast %293 : vector<1x1x32xf32> to vector<1x32xf32>
    %c1_157 = arith.constant 1 : index
    %c0_158 = arith.constant 0 : index
    %c0_159 = arith.constant 0 : index
    %295 = vector.load %arg8[%c1_157, %c0_158, %c0_159] : memref<2x1x32xf32, #tpu.memory_space<vmem>>, vector<1x1x32xf32>
    %296 = vector.shape_cast %295 : vector<1x1x32xf32> to vector<1x32xf32>
    %cst_160 = arith.constant dense<0.000000e+00> : vector<16xf32>
    %297 = vector.multi_reduction <add>, %292, %cst_160 [1] : vector<16x32xf32> to vector<16xf32>
    %298 = vector.shape_cast %297 : vector<16xf32> to vector<16x1xf32>
    %cst_161 = arith.constant 3.200000e+01 : f32
    %299 = vector.broadcast %cst_161 : f32 to vector<16x1xf32>
    %300 = arith.divf %298, %299 : vector<16x1xf32>
    %301 = vector.broadcast %300 : vector<16x1xf32> to vector<16x32xf32>
    %302 = arith.subf %292, %301 : vector<16x32xf32>
    %303 = arith.mulf %302, %302 : vector<16x32xf32>
    %cst_162 = arith.constant dense<0.000000e+00> : vector<16xf32>
    %304 = vector.multi_reduction <add>, %303, %cst_162 [1] : vector<16x32xf32> to vector<16xf32>
    %305 = vector.shape_cast %304 : vector<16xf32> to vector<16x1xf32>
    %cst_163 = arith.constant 3.200000e+01 : f32
    %306 = vector.broadcast %cst_163 : f32 to vector<16x1xf32>
    %307 = arith.divf %305, %306 : vector<16x1xf32>
    %308 = vector.broadcast %300 : vector<16x1xf32> to vector<16x32xf32>
    %309 = arith.subf %292, %308 : vector<16x32xf32>
    %cst_164 = arith.constant 9.99999974E-6 : f32
    %310 = vector.broadcast %cst_164 : f32 to vector<16x1xf32>
    %311 = arith.addf %307, %310 : vector<16x1xf32>
    %312 = math.rsqrt %311 : vector<16x1xf32>
    %313 = vector.broadcast %312 : vector<16x1xf32> to vector<16x32xf32>
    %314 = arith.mulf %309, %313 : vector<16x32xf32>
    %315 = vector.broadcast %294 : vector<1x32xf32> to vector<16x32xf32>
    %316 = arith.mulf %314, %315 : vector<16x32xf32>
    %317 = vector.broadcast %296 : vector<1x32xf32> to vector<16x32xf32>
    %318 = arith.addf %316, %317 : vector<16x32xf32>
    %c0_165 = arith.constant 0 : index
    %c0_166 = arith.constant 0 : index
    %319 = vector.load %arg13[%c0_165, %c0_166] : memref<16x32xf32, #tpu.memory_space<vmem>>, vector<16x32xf32>
    tpu.vector_store %arg13[%c0_165, %c0_166], %318 {strides = array<i32>} : memref<16x32xf32, #tpu.memory_space<vmem>>, vector<16x32xf32>,
    return
  }
}

</mosaic_0001>

<bundles_post_ra>
// kernel: transformer_encoder_pallas.1
= control target key start
LH: loop header
LB: loop body
LE: loop exit
PB: predicated region body
PF: predicated region fallthrough
CT: control target
= control target key end

     0   :  { %18 = vsyncpa [#allocation3], 0  ;;  %s5561_s0 = inlined_call_operand.hbm [shape: f32[16,32], index: 0, kind: input, shape index: {}]   ;;  %s5562_s1 = inlined_call_operand.vmem [shape: f32[2,32,96], index: 1, kind: input, shape index: {}]   ;;  %s5563_s2 = inlined_call_operand.vmem [shape: f32[2,1,96], index: 2, kind: input, shape index: {}]   ;;  %s5564_s3 = inlined_call_operand.vmem [shape: f32[2,4,8,32], index: 3, kind: input, shape index: {}]   ;;  %s5565_s4 = inlined_call_operand.vmem [shape: f32[2,1,32], index: 4, kind: input, shape index: {}]   ;;  %s5566_s5 = inlined_call_operand.vmem [shape: f32[2,1,32], index: 5, kind: input, shape index: {}]   ;;  %s5567_s6 = inlined_call_operand.vmem [shape: f32[2,1,32], index: 6, kind: input, shape index: {}]   ;;  %s5568_s7 = inlined_call_operand.vmem [shape: f32[2,1,32], index: 7, kind: input, shape index: {}]   ;;  %s5569_s8 = inlined_call_operand.vmem [shape: f32[2,1,32], index: 8, kind: input, shape index: {}]   ;;  %s5570_s9 = inlined_call_operand.vmem [shape: f32[2,32,64], index: 9, kind: input, shape index: {}]   ;;  %s5571_s10 = inlined_call_operand.vmem [shape: f32[2,1,64], index: 10, kind: input, shape index: {}]   ;;  %s5572_s11 = inlined_call_operand.vmem [shape: f32[2,64,32], index: 11, kind: input, shape index: {}]   ;;  %s5573_s12 = inlined_call_operand.vmem [shape: f32[2,1,32], index: 12, kind: input, shape index: {}]   ;;  %s5574_s13 = inlined_call_operand.hbm [shape: f32[16,32], index: 13, kind: output, shape index: {}]  }
   0x1   :  { %19 = vsyncpa [#allocation4], 0  ;;  %s4926_s25 = smov [#allocation2]   ;;  %s4878_s29 = scalar_lea.hbm %s5561_s0, 256 }
   0x2   :  { %s25_s26 = sshll.u32 %s4926_s25, 4  ;;  %p4879_p0 = scmp.ne.s32.totalorder %s5561_s0, %s4878_s29  ;;  %s26_s26 = int_to_ptr.vmem [resolvable:$true] %s25_s26 }
   0x3   :  { %p4882_p1 = scmp.lt.u32.totalorder %s4878_s29, %s5561_s0 }
   0x5   :  { %p4884_p2 = pnand %p4882_p1, %p4879_p0 }
   0x7   :  { %4887 = shalt.err (!%p4884_p2)
}
   0x8   :  { %s4888_s17 = scalar_lea.vmem %s26_s26, 256  ;;  %p4893_p4 = scmp.lt.s32.totalorder %s26_s26, %s26_s26 }
   0x9   :  { %p4889_p3 = scmp.ne.s32.totalorder %s26_s26, %s4888_s17  ;;  %p4894_p5 = scmp.lt.s32.totalorder %s4888_s17, %s4888_s17 }
   0xb   :  { %p4895_p6 = por %p4894_p5, %p4893_p4 }
   0xd   :  { %p4896_p7 = pnand %p4895_p6, %p4889_p3 }
   0xf   :  { %4899 = shalt.err (!%p4896_p7)
}
  0x10   :  { %s5575_s18 = smov 128   ;;  %s5576_s19 = smov 8  }
  0x11   :  { %31 = dma.hbm_to_vmem [thread:$0]  %s5561_s0, 256, %s26_s26, [#allocation3], %s5575_s18, %s5575_s18, %s5576_s19  }
  0x12   :  { %4922 = dma.done.wait [#allocation3], 256  }
  0x13   :  { %4923 = vsyncadd [#allocation3], 4294967040  ;;  %vm72_vm0 = vcmask 261120   ;;  %v61_v0 = vld [vmem:[%s5562_s1] sm:$0xff]  ;;  %v62_v1 = vld [vmem:[%s5562_s1 + $0x8] sm:$0xff]  ;;  %v4929_v8 = vmov 0.0  }
  0x14   :  { %v63_v2 = vld [vmem:[%s5562_s1 + $0x10] sm:$0xff]  ;;  %v4705_v3 = vpack.c.bf16 %v62_v1, %v61_v0  ;;  %v64_v4 = vld [vmem:[%s5562_s1 + $0x18] sm:$0xff]  ;;  %v5040_v5 = vld [vmem:[#allocation2] sm:$0xff]  ;;  %4444 = vmatprep.subr.mxu0 %v4929_v8  ;;  %vm4930_vm1 = vmmov 0   ;;  %s4931_s14 = smov 96   ;;  %s4932_s15 = smov 64  }
  0x15   :  { %v4709_v6 = vpack.c.bf16 %v64_v4, %v63_v2  ;;  %4431 = vmatprep.mubr.msk.f32.mxu1 %vm72_vm0, %v5040_v5  ;;  %v5044_v7 = vld [vmem:[#allocation2 + $0x8] sm:$0xff]  ;;  %4446 = vmatprep.mubr.msk.f32.mxu0 %vm4930_vm1, %v4929_v8  ;;  %v4168_v9 = vld [vmem:[%s5563_s2] ss:$0 sm:$0xff]  ;;  %s4933_s16 = smov 120   ;;  %vm157_vm2 = vcmask 64512   ;;  %s4934_s17 = smov 88  }
  0x16   :  { %4706 = vmatprep.subr.bf16.mxu1 %v4705_v3  ;;  %s4935_s20 = smov 80   ;;  %s4936_s21 = smov 56   ;;  %vm1973_vm3 = vcmask 523264  }
  0x17   :  { %4708 = vmatpush3.bf16.msra.mxu1 %v4705_v3  ;;  %s4937_s22 = smov 112   ;;  %s4938_s23 = smov 48  }
  0x18   :  { %4710 = vmatprep.subr.bf16.mxu1 %v4709_v6  ;;  %s5581_s24 = smov 72   ;;  %s5579_s25 = smov 104  }
  0x19   :  { %s5577_s27 = smov 40   ;;  %s4942_s18 = smov [#allocation5]  }
  0x1b   :  { %4712 = vmatpush3.bf16.msra.mxu1 %v4709_v6 }
  0x1c   :  { %4434 = vmatprep.subr.mxu1 %v4929_v8 }
  0x1e   :  { %4432 = vmatmul.mubr.msk.f32.vlgmr.msra.gmra.mrb[0].mxu1 %vm72_vm0, %v5044_v7 }
  0x1f   :  { %4436 = vmatprep.mubr.msk.f32.mxu1 %vm4930_vm1, %v4929_v8 }
  0xf1   :  { %v4433_v10 = vpop.f32.mrb[0].mxu1 }
  0xf2   :  { %v145_v11 = vpop.f32.mrb[1].mxu1  ;;  %v5061_v13 = vadd.f32 %v4433_v10, %v4168_v9 }
  0xf3   :  { %v5057_v12 = vadd.f32 %v4168_v9, %v145_v11 }
  0xf5   :  { %155 = vrot.lane.b32.xlu0 %v5057_v12, %s4931_s14 }
  0xf9   :  { %233 = vrot.lane.b32.xlu0 %v5061_v13, %s4931_s14 }
  0xfd   :  { %407 = vrot.lane.b32.xlu0 %v5061_v13, %s4932_s15 }
 0x101   :  { %562 = vrot.lane.b32.xlu0 %v5061_v13, %s4933_s16 }
 0x167   :  { %v156_v14 = vpop.permute.xlu0 %155 }
 0x168   :  { %4435 = vmatpush3.xpose.msk.msra.mxu1 %vm157_vm2, %v156_v14 }
 0x169   :  { %4439 = vmatprep.subr.mxu1 %v4929_v8 }
 0x16b   :  { %4437 = vmatmul.mubr.msk.f32.vlgmr.msra.gmra.mrb[2].mxu1 %vm157_vm2, %v5057_v12  ;;  %v234_v15 = vpop.permute.xlu0 %233 }
 0x16c   :  { %4440 = vmatpush3.xpose.msk.msra.mxu1 %vm157_vm2, %v234_v15  ;;  %4441 = vmatprep.mubr.msk.f32.mxu1 %vm4930_vm1, %v4929_v8 }
 0x16d   :  { %4449 = vmatprep.subr.mxu1 %v4929_v8 }
 0x16f   :  { %4442 = vmatmul.mubr.msk.f32.vlgmr.msra.gmra.mrb[4].mxu1 %vm157_vm2, %v5061_v13  ;;  %v408_v16 = vpop.permute.xlu0 %407 }
 0x170   :  { %4450 = vmatpush3.msra.mxu1 %v408_v16  ;;  %4451 = vmatprep.mubr.msk.f32.mxu1 %vm4930_vm1, %v4929_v8 }
 0x171   :  { %4459 = vmatprep.subr.mxu1 %v4929_v8 }
 0x173   :  { %v563_v23 = vpop.permute.xlu0 %562 }
 0x23e   :  { %v228_v17 = vpop.f32.mrb[2].mxu1 }
 0x23f   :  { %v4438_v18 = vpop.f32.mrb[3].mxu1  ;;  %v309_v19 = vsel %vm157_vm2, %v228_v17, -inf }
 0x240   :  { %310 = vmax.xlane.f32.xlu0 %v309_v19  ;;  %v483_v18 = vld [vmem:[%s5564_s3] sm:$0xff] }
 0x242   :  { %v305_v20 = vpop.f32.mrb[4].mxu1 }
 0x243   :  { %v4443_v21 = vpop.f32.mrb[5].mxu1  ;;  %v312_v22 = vsel %vm157_vm2, %v305_v20, -inf }
 0x244   :  { %313 = vmax.xlane.f32.xlu1 %v312_v22 }
 0x256   :  { %331 = vrot.lane.b32.xlu0 %v5057_v12, %s4932_s15 }
 0x25a   :  { %484 = vrot.lane.b32.xlu0 %v5057_v12, %s4933_s16 }
 0x2cd   :  { %v311_v24 = vpop.xlane.xlu0 %310 }
 0x2ce   :  { %v315_v31 = vsub.f32 %v228_v17, %v311_v24  ;;  %v4183_v17 = vld [vmem:[%s5564_s3 + $0x8] sm:$0xff] }
 0x2d0   :  { %v317_v32 = vmul.f32 1.442695, %v315_v31 }
 0x2d1   :  { %v314_v25 = vpop.xlane.xlu1 %313  ;;  %v332_v26 = vpop.permute.xlu0 %331 }
 0x2d2   :  { %v316_v27 = vsub.f32 %v305_v20, %v314_v25  ;;  %4445 = vmatpush3.msra.mxu0 %v332_v26 }
 0x2d3   :  { %4454 = vmatprep.subr.mxu0 %v4929_v8 }
 0x2d4   :  { %v319_v28 = vmul.f32 1.442695, %v316_v27 }
 0x2d5   :  { %v485_v43 = vpop.permute.xlu0 %484 }
 0x2d6   :  { %4798 = vpow2.f32 %v319_v28 }
 0x2d7   :  { %4800 = vpow2.f32 %v317_v32 }
 0x2e0   :  { %v4799_v29 = vpop.eup %4798 }
 0x2e1   :  { %v324_v30 = vsel %vm157_vm2, %v4799_v29, 0.0  ;;  %v4801_v33 = vpop.eup %4800 }
 0x2e2   :  { %325 = vadd.xlane.f32.xlu1 %v324_v30  ;;  %v321_v34 = vsel %vm157_vm2, %v4801_v33, 0.0 }
 0x2f3   :  { %564 = vrot.lane.b32.xlu1 %v5061_v13, %s4934_s17 }
 0x317   :  { %322 = vadd.xlane.f32.xlu1 %v321_v34 }
 0x328   :  { %486 = vrot.lane.b32.xlu1 %v5057_v12, %s4934_s17 }
 0x32c   :  { %980 = vrot.lane.b32.xlu1 %v5057_v12, %s4935_s20 }
 0x36f   :  { %v326_v35 = vpop.xlane.xlu1 %325 }
 0x370   :  { %4802 = vrcp.f32 %v326_v35 }
 0x373   :  { %v565_v38 = vpop.permute.xlu1 %564 }
 0x37a   :  { %v4803_v36 = vpop.eup %4802 }
 0x37b   :  { %v330_v37 = vmul.f32 %v4803_v36, %v4799_v29 }
 0x37d   :  { %4452 = vmatmul.mubr.msk.f32.vlgmr.msra.gmra.mrb[6].mxu1 %vm157_vm2, %v330_v37 }
 0x37e   :  { %4460 = vmatpush3.xpose.msk.msra.mxu1 %vm157_vm2, %v565_v38  ;;  %4461 = vmatprep.mubr.msk.f32.mxu1 %vm4930_vm1, %v4929_v8 }
 0x37f   :  { %4469 = vmatprep.subr.mxu1 %v4929_v8 }
 0x381   :  { %4462 = vmatmul.mubr.msk.f32.vlgmr.msra.gmra.mrb[8].mxu1 %vm157_vm2, %v563_v23 }
 0x382   :  { %4471 = vmatprep.mubr.msk.f32.mxu1 %vm4930_vm1, %v4929_v8 }
 0x3a4   :  { %v323_v39 = vpop.xlane.xlu1 %322 }
 0x3a5   :  { %4804 = vrcp.f32 %v323_v39 }
 0x3a8   :  { %v487_v42 = vpop.permute.xlu1 %486 }
 0x3ac   :  { %v981_v4 = vpop.permute.xlu1 %980 }
 0x3af   :  { %v4805_v40 = vpop.eup %4804 }
 0x3b0   :  { %v328_v41 = vmul.f32 %v4805_v40, %v4801_v33  ;;  %v4194_v40 = vld [vmem:[%s5564_s3 + $0x10] sm:$0xff] }
 0x3b2   :  { %4447 = vmatmul.mubr.msk.f32.vlgmr.msra.gmra.mrb[0].mxu0 %vm157_vm2, %v328_v41 }
 0x3b3   :  { %4455 = vmatpush3.xpose.msk.msra.mxu0 %vm157_vm2, %v487_v42  ;;  %4456 = vmatprep.mubr.msk.f32.mxu0 %vm4930_vm1, %v4929_v8 }
 0x3b4   :  { %4464 = vmatprep.subr.mxu0 %v4929_v8 }
 0x3b6   :  { %4457 = vmatmul.mubr.msk.f32.vlgmr.msra.gmra.mrb[2].mxu0 %vm157_vm2, %v485_v43 }
 0x3b7   :  { %4466 = vmatprep.mubr.msk.f32.mxu0 %vm4930_vm1, %v4929_v8 }
 0x450   :  { %v5113_v44 = vpop.f32.mrb[6].mxu1 }
 0x451   :  { %v4453_v45 = vpop.f32.mrb[7].mxu1 }
 0x454   :  { %v636_v46 = vpop.f32.mrb[8].mxu1 }
 0x455   :  { %v4463_v47 = vpop.f32.mrb[9].mxu1  ;;  %v643_v48 = vsel %vm157_vm2, %v636_v46, -inf }
 0x456   :  { %644 = vmax.xlane.f32.xlu0 %v643_v48 }
 0x46c   :  { %738 = vrot.lane.b32.xlu0 %v5061_v13, %s4936_s21 }
 0x470   :  { %978 = vrot.lane.b32.xlu0 %v5057_v12, %s4937_s22 }
 0x474   :  { %1058 = vrot.lane.b32.xlu0 %v5061_v13, %s4935_s20 }
 0x485   :  { %v5122_v49 = vpop.f32.mrb[0].mxu0 }
 0x486   :  { %v4448_v50 = vpop.f32.mrb[1].mxu0 }
 0x489   :  { %v558_v51 = vpop.f32.mrb[2].mxu0 }
 0x48a   :  { %v4458_v52 = vpop.f32.mrb[3].mxu0  ;;  %v640_v53 = vsel %vm157_vm2, %v558_v51, -inf }
 0x493   :  { %641 = vmax.xlane.f32.xlu0 %v640_v53 }
 0x4a9   :  { %662 = vrot.lane.b32.xlu0 %v5057_v12, %s4936_s21 }
 0x4ad   :  { %1156 = vrot.lane.b32.xlu0 %v5057_v12, %s4938_s23 }
 0x4b1   :  { %1395 = vrot.lane.b32.xlu0 %v5057_v12, %s5581_s24 }
 0x4b5   :  { %1473 = vrot.lane.b32.xlu0 %v5061_v13, %s5581_s24 }
 0x4b9   :  { %1393 = vrot.lane.b32.xlu0 %v5057_v12, %s5579_s25 }
 0x4bd   :  { %1471 = vrot.lane.b32.xlu0 %v5061_v13, %s5579_s25 }
 0x4e3   :  { %v645_v54 = vpop.xlane.xlu0 %644 }
 0x4e4   :  { %v647_v55 = vsub.f32 %v636_v46, %v645_v54 }
 0x4e6   :  { %v650_v56 = vmul.f32 1.442695, %v647_v55 }
 0x4e7   :  { %v739_v57 = vpop.permute.xlu0 %738 }
 0x4e8   :  { %4806 = vpow2.f32 %v650_v56  ;;  %4470 = vmatpush3.msra.mxu1 %v739_v57 }
 0x4e9   :  { %4484 = vmatprep.subr.mxu1 %v4929_v8 }
 0x4eb   :  { %v979_v60 = vpop.permute.xlu0 %978 }
 0x4ef   :  { %v1059_v61 = vpop.permute.xlu0 %1058 }
 0x4f2   :  { %v4807_v58 = vpop.eup %4806 }
 0x4f3   :  { %v655_v59 = vsel %vm157_vm2, %v4807_v58, 0.0 }
 0x4f4   :  { %656 = vadd.xlane.f32.xlu1 %v655_v59 }
 0x505   :  { %1056 = vrot.lane.b32.xlu1 %v5061_v13, %s4937_s22 }
 0x520   :  { %v642_v62 = vpop.xlane.xlu0 %641 }
 0x521   :  { %v646_v63 = vsub.f32 %v558_v51, %v642_v62 }
 0x523   :  { %v648_v0 = vmul.f32 1.442695, %v646_v63 }
 0x524   :  { %v663_v1 = vpop.permute.xlu0 %662 }
 0x525   :  { %4808 = vpow2.f32 %v648_v0  ;;  %4465 = vmatpush3.msra.mxu0 %v663_v1 }
 0x526   :  { %4474 = vmatprep.subr.mxu0 %v4183_v17 }
 0x528   :  { %v1157_v29 = vpop.permute.xlu0 %1156 }
 0x52f   :  { %v4809_v2 = vpop.eup %4808 }
 0x530   :  { %v652_v3 = vsel %vm157_vm2, %v4809_v2, 0.0 }
 0x531   :  { %653 = vadd.xlane.f32.xlu1 %v652_v3 }
 0x581   :  { %v657_v6 = vpop.xlane.xlu1 %656 }
 0x582   :  { %4810 = vrcp.f32 %v657_v6 }
 0x585   :  { %v1057_v11 = vpop.permute.xlu1 %1056 }
 0x58c   :  { %v4811_v9 = vpop.eup %4810 }
 0x58d   :  { %v661_v10 = vmul.f32 %v4811_v9, %v4807_v58 }
 0x58f   :  { %4472 = vmatmul.mubr.msk.f32.vlgmr.msra.gmra.mrb[10].mxu1 %vm157_vm2, %v661_v10 }
 0x590   :  { %4485 = vmatpush3.xpose.msk.msra.mxu1 %vm157_vm2, %v981_v4  ;;  %4486 = vmatprep.mubr.msk.f32.mxu1 %vm4930_vm1, %v4929_v8 }
 0x591   :  { %4489 = vmatprep.subr.mxu1 %v4929_v8 }
 0x593   :  { %4487 = vmatmul.mubr.msk.f32.vlgmr.msra.gmra.mrb[12].mxu1 %vm157_vm2, %v979_v60 }
 0x594   :  { %4490 = vmatpush3.xpose.msk.msra.mxu1 %vm157_vm2, %v1059_v61  ;;  %4491 = vmatprep.mubr.msk.f32.mxu1 %vm4930_vm1, %v4929_v8 }
 0x595   :  { %4499 = vmatprep.subr.mxu1 %v4929_v8 }
 0x597   :  { %4492 = vmatmul.mubr.msk.f32.vlgmr.msra.gmra.mrb[14].mxu1 %vm157_vm2, %v1057_v11 }
 0x598   :  { %4501 = vmatprep.mubr.msk.f32.mxu1 %vm4930_vm1, %v4929_v8 }
 0x5be   :  { %v654_v14 = vpop.xlane.xlu1 %653 }
 0x5bf   :  { %4812 = vrcp.f32 %v654_v14 }
 0x5c9   :  { %v4813_v15 = vpop.eup %4812 }
 0x5ca   :  { %v659_v16 = vmul.f32 %v4813_v15, %v4809_v2 }
 0x5cc   :  { %4467 = vmatmul.mubr.msk.f32.vlgmr.msra.gmra.mrb[4].mxu0 %vm157_vm2, %v659_v16 }
 0x5cd   :  { %4475 = vmatpush3.msra.mxu0 %v4183_v17  ;;  %v4203_v17 = vld [vmem:[%s5564_s3 + $0x18] sm:$0xff] }
 0x5ce   :  { %4479 = vmatprep.subr.mxu0 %v483_v18 }
 0x662   :  { %v810_v19 = vpop.f32.mrb[10].mxu1 }
 0x663   :  { %v4473_v20 = vpop.f32.mrb[11].mxu1 }
 0x666   :  { %v1052_v21 = vpop.f32.mrb[12].mxu1 }
 0x667   :  { %v4488_v22 = vpop.f32.mrb[13].mxu1  ;;  %v1134_v23 = vsel %vm157_vm2, %v1052_v21, -inf }
 0x668   :  { %1135 = vmax.xlane.f32.xlu1 %v1134_v23 }
 0x66a   :  { %v1130_v24 = vpop.f32.mrb[14].mxu1 }
 0x66b   :  { %v4493_v25 = vpop.f32.mrb[15].mxu1  ;;  %v1137_v26 = vsel %vm157_vm2, %v1130_v24, -inf }
 0x66c   :  { %1138 = vmax.xlane.f32.xlu1 %v1137_v26 }
 0x69f   :  { %v734_v27 = vpop.f32.mrb[4].mxu0 }
 0x6a0   :  { %v4468_v28 = vpop.f32.mrb[5].mxu0  ;;  %4476 = vmatprep.mubr.msk.f32.mxu0 %vm157_vm2, %v734_v27 }
 0x6a1   :  { %4477 = vmatmul.mubr.msk.f32.vlgmr.msra.gmra.mrb[6].mxu0 %vm157_vm2, %v810_v19 }
 0x6a2   :  { %4481 = vmatprep.mubr.msk.f32.mxu0 %vm157_vm2, %v5122_v49  ;;  %4480 = vmatpush3.msra.mxu0 %v483_v18 }
 0x6a3   :  { %4494 = vmatprep.subr.mxu0 %v4929_v8 }
 0x6a9   :  { %4482 = vmatmul.mubr.msk.f32.vlgmr.msra.gmra.mrb[6].mxu0 %vm157_vm2, %v5113_v44  ;;  %v1396_v44 = vpop.permute.xlu0 %1395 }
 0x6aa   :  { %4495 = vmatpush3.msra.mxu0 %v1157_v29  ;;  %4496 = vmatprep.mubr.msk.f32.mxu0 %vm4930_vm1, %v4929_v8 }
 0x6ab   :  { %4504 = vmatprep.subr.mxu0 %v4194_v40 }
 0x6ad   :  { %v1474_v48 = vpop.permute.xlu0 %1473 }
 0x6b1   :  { %v1394_v50 = vpop.permute.xlu0 %1393 }
 0x6b5   :  { %v1472_v55 = vpop.permute.xlu0 %1471 }
 0x6f5   :  { %v1136_v30 = vpop.xlane.xlu1 %1135 }
 0x6f6   :  { %v1140_v31 = vsub.f32 %v1052_v21, %v1136_v30 }
 0x6f8   :  { %v1142_v32 = vmul.f32 1.442695, %v1140_v31 }
 0x6f9   :  { %v1139_v33 = vpop.xlane.xlu1 %1138 }
 0x6fa   :  { %4814 = vpow2.f32 %v1142_v32  ;;  %v1141_v34 = vsub.f32 %v1130_v24, %v1139_v33  ;;  %v4206_v24 = vld [vmem:[%s5565_s4] ss:$0 sm:$0xff] }
 0x6fc   :  { %v1144_v35 = vmul.f32 1.442695, %v1141_v34 }
 0x6fe   :  { %4816 = vpow2.f32 %v1144_v35 }
 0x704   :  { %v4815_v36 = vpop.eup %4814 }
 0x705   :  { %v1146_v37 = vsel %vm157_vm2, %v4815_v36, 0.0 }
 0x706   :  { %1147 = vadd.xlane.f32.xlu1 %v1146_v37 }
 0x708   :  { %v4817_v38 = vpop.eup %4816 }
 0x709   :  { %v1149_v39 = vsel %vm157_vm2, %v4817_v38, 0.0 }
 0x70a   :  { %1150 = vadd.xlane.f32.xlu1 %v1149_v39 }
 0x71b   :  { %1232 = vrot.lane.b32.xlu1 %v5061_v13, %s4938_s23 }
 0x793   :  { %v1148_v41 = vpop.xlane.xlu1 %1147 }
 0x794   :  { %4818 = vrcp.f32 %v1148_v41 }
 0x797   :  { %v1151_v42 = vpop.xlane.xlu1 %1150 }
 0x798   :  { %4820 = vrcp.f32 %v1151_v42  ;;  %v1865_v42 = vld [vmem:[%s5570_s9 + $0x8] sm:$0xff] }
 0x79b   :  { %v1233_v43 = vpop.permute.xlu1 %1232 }
 0x79c   :  { %4500 = vmatpush3.msra.mxu1 %v1233_v43 }
 0x79d   :  { %4509 = vmatprep.subr.mxu1 %v4929_v8 }
 0x79e   :  { %v4819_v45 = vpop.eup %4818 }
 0x79f   :  { %v1153_v46 = vmul.f32 %v4819_v45, %v4815_v36  ;;  %v1867_v45 = vld [vmem:[%s5570_s9 + $0x18] sm:$0xff] }
 0x7a1   :  { %4497 = vmatmul.mubr.msk.f32.vlgmr.msra.gmra.mrb[8].mxu0 %vm157_vm2, %v1153_v46 }
 0x7a2   :  { %v4821_v47 = vpop.eup %4820  ;;  %4505 = vmatpush3.msra.mxu0 %v4194_v40 }
 0x7a3   :  { %v1155_v49 = vmul.f32 %v4821_v47, %v4817_v38  ;;  %4514 = vmatprep.subr.mxu0 %v4929_v8  ;;  %v1958_v47 = vld [vmem:[%s5572_s11] sm:$0xff] }
 0x7a5   :  { %4502 = vmatmul.mubr.msk.f32.vlgmr.msra.gmra.mrb[16].mxu1 %vm157_vm2, %v1155_v49  ;;  %v1960_v49 = vld [vmem:[%s5572_s11 + $0x10] sm:$0xff] }
 0x7a6   :  { %4510 = vmatpush3.xpose.msk.msra.mxu1 %vm157_vm2, %v1396_v44  ;;  %4511 = vmatprep.mubr.msk.f32.mxu1 %vm4930_vm1, %v4929_v8  ;;  %v1866_v44 = vld [vmem:[%s5570_s9 + $0x10] sm:$0xff] }
 0x7a7   :  { %4519 = vmatprep.subr.mxu1 %v4929_v8  ;;  %v4717_v46 = vpack.c.bf16 %v1867_v45, %v1866_v44 }
 0x7a9   :  { %4512 = vmatmul.mubr.msk.f32.vlgmr.msra.gmra.mrb[18].mxu1 %vm157_vm2, %v1394_v50 }
 0x7aa   :  { %4521 = vmatprep.mubr.msk.f32.mxu1 %vm4930_vm1, %v4929_v8 }
 0x874   :  { %v1228_v51 = vpop.f32.mrb[8].mxu0 }
 0x875   :  { %v4498_v52 = vpop.f32.mrb[9].mxu0  ;;  %4506 = vmatprep.mubr.msk.f32.mxu0 %vm157_vm2, %v1228_v51  ;;  %v1961_v51 = vld [vmem:[%s5572_s11 + $0x18] sm:$0xff] }
 0x876   :  { %v4725_v52 = vpack.c.bf16 %v1961_v51, %v1960_v49  ;;  %v4215_v51 = vld [vmem:[%s5568_s7] ss:$0 sm:$0xff] }
 0x878   :  { %v1304_v53 = vpop.f32.mrb[16].mxu1 }
 0x879   :  { %v4503_v54 = vpop.f32.mrb[17].mxu1  ;;  %4507 = vmatmul.mubr.msk.f32.vlgmr.msra.gmra.mrb[6].mxu0 %vm157_vm2, %v1304_v53  ;;  %v1962_v53 = vld [vmem:[%s5572_s11 + $0x20] sm:$0xff] }
 0x87a   :  { %4515 = vmatpush3.xpose.msk.msra.mxu0 %vm157_vm2, %v1474_v48  ;;  %4516 = vmatprep.mubr.msk.f32.mxu0 %vm4930_vm1, %v4929_v8  ;;  %v1959_v48 = vld [vmem:[%s5572_s11 + $0x8] sm:$0xff] }
 0x87b   :  { %4524 = vmatprep.subr.mxu0 %v4929_v8  ;;  %v4721_v50 = vpack.c.bf16 %v1959_v48, %v1958_v47  ;;  %v1963_v54 = vld [vmem:[%s5572_s11 + $0x28] sm:$0xff] }
 0x87c   :  { %v1467_v56 = vpop.f32.mrb[18].mxu1 }
 0x87d   :  { %v4513_v57 = vpop.f32.mrb[19].mxu1  ;;  %4517 = vmatmul.mubr.msk.f32.vlgmr.msra.gmra.mrb[10].mxu0 %vm157_vm2, %v1472_v55  ;;  %v1549_v58 = vsel %vm157_vm2, %v1467_v56, -inf  ;;  %v4729_v55 = vpack.c.bf16 %v1963_v54, %v1962_v53 }
 0x87e   :  { %1550 = vmax.xlane.f32.xlu1 %v1549_v58  ;;  %4526 = vmatprep.mubr.msk.f32.mxu0 %vm4930_vm1, %v4929_v8 }
 0x90b   :  { %v1551_v59 = vpop.xlane.xlu1 %1550 }
 0x90c   :  { %v1555_v60 = vsub.f32 %v1467_v56, %v1551_v59 }
 0x90e   :  { %v1557_v61 = vmul.f32 1.442695, %v1555_v60 }
 0x910   :  { %4822 = vpow2.f32 %v1557_v61 }
 0x91a   :  { %v4823_v1 = vpop.eup %4822 }
 0x91b   :  { %v1561_v2 = vsel %vm157_vm2, %v4823_v1, 0.0 }
 0x950   :  { %v1545_v62 = vpop.f32.mrb[10].mxu0 }
 0x951   :  { %v4518_v63 = vpop.f32.mrb[11].mxu0  ;;  %v1552_v0 = vsel %vm157_vm2, %v1545_v62, -inf }
 0x952   :  { %1553 = vmax.xlane.f32.xlu0 %v1552_v0  ;;  %v4207_v63 = vld [vmem:[%s5566_s5] ss:$0 sm:$0xff] }
 0x956   :  { %1562 = vadd.xlane.f32.xlu0 %v1561_v2 }
 0x96c   :  { %1571 = vrot.lane.b32.xlu0 %v5057_v12, %s5577_s27 }
 0x9df   :  { %v1554_v3 = vpop.xlane.xlu0 %1553 }
 0x9e0   :  { %v1556_v4 = vsub.f32 %v1545_v62, %v1554_v3  ;;  %v4208_v3 = vld [vmem:[%s5567_s6] ss:$0 sm:$0xff] }
 0x9e2   :  { %v1559_v6 = vmul.f32 1.442695, %v1556_v4 }
 0x9e3   :  { %v1563_v9 = vpop.xlane.xlu0 %1562 }
 0x9e4   :  { %4824 = vpow2.f32 %v1559_v6 }
 0x9e5   :  { %4826 = vrcp.f32 %v1563_v9 }
 0x9e7   :  { %v1572_v10 = vpop.permute.xlu0 %1571 }
 0x9e8   :  { %4520 = vmatpush3.msra.mxu1 %v1572_v10 }
 0x9ee   :  { %v4825_v11 = vpop.eup %4824 }
 0x9ef   :  { %v4827_v14 = vpop.eup %4826  ;;  %v1564_v15 = vsel %vm157_vm2, %v4825_v11, 0.0 }
 0x9f0   :  { %v1568_v16 = vmul.f32 %v4827_v14, %v4823_v1  ;;  %1565 = vadd.xlane.f32.xlu1 %v1564_v15  ;;  %v1965_v14 = vld [vmem:[%s5572_s11 + $0x38] sm:$0xff] }
 0x9f2   :  { %4522 = vmatmul.mubr.msk.f32.vlgmr.msra.gmra.mrb[20].mxu1 %vm157_vm2, %v1568_v16  ;;  %v4209_v16 = vld [vmem:[%s5571_s10] ss:$0 sm:$0xff] }
 0xa01   :  { %1647 = vrot.lane.b32.xlu1 %v5061_v13, %s5577_s27 }
 0xa7d   :  { %v1566_v12 = vpop.xlane.xlu1 %1565 }
 0xa7e   :  { %4828 = vrcp.f32 %v1566_v12 }
 0xa81   :  { %v1648_v18 = vpop.permute.xlu1 %1647 }
 0xa82   :  { %4525 = vmatpush3.msra.mxu0 %v1648_v18 }
 0xa83   :  { %4529 = vmatprep.subr.mxu0 %v4203_v17 }
 0xa88   :  { %v4829_v19 = vpop.eup %4828 }
 0xa89   :  { %v1570_v20 = vmul.f32 %v4829_v19, %v4825_v11  ;;  %v1964_v11 = vld [vmem:[%s5572_s11 + $0x30] sm:$0xff] }
 0xa8a   :  { %v4733_v15 = vpack.c.bf16 %v1965_v14, %v1964_v11 }
 0xa8b   :  { %4527 = vmatmul.mubr.msk.f32.vlgmr.msra.gmra.mrb[12].mxu0 %vm157_vm2, %v1570_v20 }
 0xa8c   :  { %4530 = vmatpush3.msra.mxu0 %v4203_v17 }
 0xa8d   :  { %4722 = vmatprep.subr.bf16.mxu0 %v4721_v50 }
 0xac5   :  { %v1643_v21 = vpop.f32.mrb[20].mxu1 }
 0xac6   :  { %v4523_v22 = vpop.f32.mrb[21].mxu1  ;;  %4531 = vmatprep.mubr.msk.f32.mxu0 %vm157_vm2, %v1643_v21 }
 0xac7   :  { %v4212_v22 = vld [vmem:[%s5573_s12] ss:$0 sm:$0xff] }
 0xb5e   :  { %v1719_v23 = vpop.f32.mrb[12].mxu0 }
 0xb5f   :  { %v4528_v13 = vpop.f32.mrb[13].mxu0  ;;  %4532 = vmatmul.mubr.msk.f32.vlgmr.msra.gmra.mrb[6].mxu0 %vm157_vm2, %v1719_v23 }
 0xb60   :  { %4724 = vmatpush3.bf16.msra.mxu0 %v4721_v50 }
 0xb61   :  { %4726 = vmatprep.subr.bf16.mxu0 %v4725_v52 }
 0xb64   :  { %4728 = vmatpush3.bf16.msra.mxu0 %v4725_v52 }
 0xb65   :  { %4730 = vmatprep.subr.bf16.mxu0 %v4729_v55 }
 0xb68   :  { %4732 = vmatpush3.bf16.msra.mxu0 %v4729_v55  ;;  %v4216_v55 = vld [vmem:[%s5569_s8] ss:$0 sm:$0xff] }
 0xb69   :  { %4734 = vmatprep.subr.bf16.mxu0 %v4733_v15 }
 0xb6c   :  { %4736 = vmatpush3.bf16.msra.mxu0 %v4733_v15 }
 0xb6d   :  { %4585 = vmatprep.subr.mxu0 %v4929_v8 }
 0xc32   :  { %v4533_v25 = vpop.f32.mrb[6].mxu0 }
 0xc33   :  { %v1816_v26 = vadd.f32 %v4533_v25, %v4206_v24  ;;  %v1797_v27 = vpop.f32.mrb[7].mxu0 }
 0xc34   :  { %v1815_v28 = vadd.f32 %v4206_v24, %v1797_v27 }
 0xc35   :  { %v1818_v29 = vadd.f32 %v1816_v26, %v5044_v7 }
 0xc36   :  { %v1817_v30 = vadd.f32 %v1815_v28, %v5040_v5  ;;  %v1864_v5 = vld [vmem:[%s5570_s9] sm:$0xff] }
 0xc37   :  { %v1824_v31 = vsel %vm72_vm0, %v1818_v29, 0.0  ;;  %v4713_v43 = vpack.c.bf16 %v1865_v42, %v1864_v5  ;;  %v4219_v5 = vld [vmem:[%s5562_s1 + $0x30] sm:$0xff]  ;;  %v4220_v42 = vld [vmem:[%s5562_s1 + $0x38] sm:$0xff] }
 0xc38   :  { %1825 = vadd.xlane.f32.xlu0 %v1824_v31  ;;  %v1821_v32 = vsel %vm72_vm0, %v1817_v30, 0.0 }
 0xc39   :  { %1822 = vadd.xlane.f32.xlu1 %v1821_v32  ;;  %4714 = vmatprep.subr.bf16.mxu1 %v4713_v43 }
 0xc3a   :  { %4716 = vmatpush3.bf16.msra.mxu1 %v4713_v43  ;;  %v4741_v43 = vpack.c.bf16 %v4220_v42, %v4219_v5 }
 0xc3b   :  { %4718 = vmatprep.subr.bf16.mxu1 %v4717_v46 }
 0xc3e   :  { %4720 = vmatpush3.bf16.msra.mxu1 %v4717_v46 }
 0xcc5   :  { %v1826_v33 = vpop.xlane.xlu0 %1825 }
 0xcc6   :  { %v1829_v34 = vmul.f32 0.03125, %v1826_v33  ;;  %v1823_v35 = vpop.xlane.xlu1 %1822 }
 0xcc7   :  { %v1828_v36 = vmul.f32 0.03125, %v1823_v35 }
 0xcc8   :  { %v1831_v37 = vsub.f32 %v1818_v29, %v1829_v34 }
 0xcc9   :  { %v1830_v38 = vsub.f32 %v1817_v30, %v1828_v36 }
 0xcca   :  { %v1833_v39 = vmul.f32 %v1831_v37, %v1831_v37 }
 0xccb   :  { %v1832_v40 = vmul.f32 %v1830_v38, %v1830_v38 }
 0xccc   :  { %v1837_v41 = vsel %vm72_vm0, %v1833_v39, 0.0 }
 0xccd   :  { %1838 = vadd.xlane.f32.xlu1 %v1837_v41  ;;  %v1834_v7 = vsel %vm72_vm0, %v1832_v40, 0.0  ;;  %v4217_v40 = vld [vmem:[%s5562_s1 + $0x20] sm:$0xff]  ;;  %v4218_v41 = vld [vmem:[%s5562_s1 + $0x28] sm:$0xff] }
 0xcce   :  { %1835 = vadd.xlane.f32.xlu0 %v1834_v7  ;;  %v4737_v7 = vpack.c.bf16 %v4218_v41, %v4217_v40 }
 0xcd0   :  { %4738 = vmatprep.subr.bf16.mxu1 %v4737_v7 }
 0xd5a   :  { %v1839_v56 = vpop.xlane.xlu1 %1838 }
 0xd5b   :  { %v1841_v57 = vmul.f32 0.03125, %v1839_v56  ;;  %v1836_v58 = vpop.xlane.xlu0 %1835 }
 0xd5c   :  { %v1840_v59 = vmul.f32 0.03125, %v1836_v58 }
 0xd5d   :  { %v1843_v60 = vadd.f32 1e-05, %v1841_v57 }
 0xd5e   :  { %v1842_v61 = vadd.f32 1e-05, %v1840_v59 }
 0xd5f   :  { %4830 = vrsqrt.f32 %v1843_v60  ;;  %v4222_v60 = vld [vmem:[%s5563_s2 + $0x1] ss:$0 sm:$0xff]  ;;  %s5583_s2 = smov 72  }
 0xd60   :  { %4832 = vrsqrt.f32 %v1842_v61 }
 0xd69   :  { %v4831_v62 = vpop.eup %4830 }
 0xd6a   :  { %v4833_v0 = vpop.eup %4832  ;;  %v1847_v1 = vmul.f32 %v4831_v62, %v1831_v37 }
 0xd6b   :  { %v1846_v2 = vmul.f32 %v4833_v0, %v1830_v38 }
 0xd6c   :  { %v1855_v4 = vmul.f32 %v4207_v63, %v1847_v1 }
 0xd6d   :  { %v1854_v6 = vmul.f32 %v4207_v63, %v1846_v2 }
 0xd6e   :  { %v1863_v10 = vadd.f32 %v4208_v3, %v1855_v4 }
 0xd6f   :  { %v1862_v9 = vadd.f32 %v4208_v3, %v1854_v6 }
 0xd71   :  { %4542 = vmatprep.mubr.msk.f32.mxu1 %vm72_vm0, %v1862_v9 }
 0xd72   :  { %4543 = vmatmul.mubr.msk.f32.vlgmr.msra.gmra.mrb[22].mxu1 %vm72_vm0, %v1863_v10 }
 0xd73   :  { %4740 = vmatpush3.bf16.msra.mxu1 %v4737_v7 }
 0xd74   :  { %4742 = vmatprep.subr.bf16.mxu1 %v4741_v43 }
 0xd77   :  { %4744 = vmatpush3.bf16.msra.mxu1 %v4741_v43 }
 0xd78   :  { %4575 = vmatprep.subr.mxu1 %v4929_v8 }
 0xe45   :  { %v4544_v12 = vpop.f32.mrb[22].mxu1 }
 0xe46   :  { %v1953_v17 = vadd.f32 %v4544_v12, %v4209_v16  ;;  %v1947_v18 = vpop.f32.mrb[23].mxu1 }
 0xe47   :  { %v1948_v19 = vadd.f32 %v4209_v16, %v1947_v18 }
 0xe48   :  { %v1957_v21 = vmax.f32 %v1953_v17, 0.0 }
 0xe49   :  { %v1956_v20 = vmax.f32 %v1948_v19, 0.0 }
 0xe4b   :  { %4561 = vmatprep.mubr.msk.f32.mxu0 %vm1973_vm3, %v1956_v20 }
 0xe4c   :  { %4562 = vmatmul.mubr.msk.f32.vlgmr.msra.gmra.mrb[14].mxu0 %vm1973_vm3, %v1957_v21 }
 0xe4d   :  { %4587 = vmatprep.mubr.msk.f32.mxu0 %vm4930_vm1, %v4929_v8 }
 0xf1f   :  { %v4563_v23 = vpop.f32.mrb[14].mxu0 }
 0xf20   :  { %v2052_v13 = vadd.f32 %v4563_v23, %v4212_v22  ;;  %v2046_v24 = vpop.f32.mrb[15].mxu0 }
 0xf21   :  { %v2047_v25 = vadd.f32 %v4212_v22, %v2046_v24 }
 0xf22   :  { %v2056_v26 = vadd.f32 %v2052_v13, %v1863_v10 }
 0xf23   :  { %v2055_v27 = vadd.f32 %v2047_v25, %v1862_v9 }
 0xf24   :  { %v2062_v28 = vsel %vm72_vm0, %v2056_v26, 0.0 }
 0xf25   :  { %2063 = vadd.xlane.f32.xlu1 %v2062_v28  ;;  %v2059_v29 = vsel %vm72_vm0, %v2055_v27, 0.0 }
 0xf26   :  { %2060 = vadd.xlane.f32.xlu0 %v2059_v29 }
 0xfb2   :  { %v2064_v30 = vpop.xlane.xlu1 %2063 }
 0xfb3   :  { %v2066_v31 = vmul.f32 0.03125, %v2064_v30  ;;  %v2061_v32 = vpop.xlane.xlu0 %2060 }
 0xfb4   :  { %v2065_v33 = vmul.f32 0.03125, %v2061_v32 }
 0xfb5   :  { %v2068_v34 = vsub.f32 %v2056_v26, %v2066_v31 }
 0xfb6   :  { %v2067_v35 = vsub.f32 %v2055_v27, %v2065_v33 }
 0xfb7   :  { %v2070_v36 = vmul.f32 %v2068_v34, %v2068_v34 }
 0xfb8   :  { %v2069_v37 = vmul.f32 %v2067_v35, %v2067_v35 }
 0xfb9   :  { %v2074_v38 = vsel %vm72_vm0, %v2070_v36, 0.0 }
 0xfba   :  { %2075 = vadd.xlane.f32.xlu1 %v2074_v38  ;;  %v2071_v39 = vsel %vm72_vm0, %v2069_v37, 0.0 }
 0xfbb   :  { %2072 = vadd.xlane.f32.xlu0 %v2071_v39 }
0x1047   :  { %v2076_v44 = vpop.xlane.xlu1 %2075 }
0x1048   :  { %v2078_v45 = vmul.f32 0.03125, %v2076_v44  ;;  %v2073_v46 = vpop.xlane.xlu0 %2072 }
0x1049   :  { %v2077_v47 = vmul.f32 0.03125, %v2073_v46 }
0x104a   :  { %v2080_v48 = vadd.f32 1e-05, %v2078_v45 }
0x104b   :  { %v2079_v49 = vadd.f32 1e-05, %v2077_v47 }
0x104c   :  { %4834 = vrsqrt.f32 %v2080_v48 }
0x104d   :  { %4836 = vrsqrt.f32 %v2079_v49 }
0x1056   :  { %v4835_v50 = vpop.eup %4834 }
0x1057   :  { %v4837_v52 = vpop.eup %4836  ;;  %v2084_v53 = vmul.f32 %v4835_v50, %v2068_v34 }
0x1058   :  { %v2083_v54 = vmul.f32 %v4837_v52, %v2067_v35 }
0x1059   :  { %v2092_v56 = vmul.f32 %v4215_v51, %v2084_v53 }
0x105a   :  { %v2091_v57 = vmul.f32 %v4215_v51, %v2083_v54 }
0x105b   :  { %v5304_v59 = vadd.f32 %v4216_v55, %v2092_v56 }
0x105c   :  { %v5302_v58 = vadd.f32 %v4216_v55, %v2091_v57 }
0x105e   :  { %4572 = vmatprep.mubr.msk.f32.mxu1 %vm72_vm0, %v5302_v58 }
0x105f   :  { %4573 = vmatmul.mubr.msk.f32.vlgmr.msra.gmra.mrb[24].mxu1 %vm72_vm0, %v5304_v59 }
0x1060   :  { %4577 = vmatprep.mubr.msk.f32.mxu1 %vm4930_vm1, %v4929_v8 }
0x1132   :  { %v4574_v61 = vpop.f32.mrb[24].mxu1 }
0x1133   :  { %v5315_v62 = vadd.f32 %v4574_v61, %v4222_v60  ;;  %v2186_v63 = vpop.f32.mrb[25].mxu1 }
0x1134   :  { %v5317_v0 = vadd.f32 %v4222_v60, %v2186_v63 }
0x1135   :  { %2273 = vrot.lane.b32.xlu1 %v5315_v62, %s4931_s14 }
0x1136   :  { %2196 = vrot.lane.b32.xlu0 %v5317_v0, %s4931_s14  ;;  %s5584_s14 = smov 104  }
0x11a7   :  { %v2274_v2 = vpop.permute.xlu1 %2273 }
0x11a8   :  { %v2197_v1 = vpop.permute.xlu0 %2196 }
0x11a9   :  { %4576 = vmatpush3.xpose.msk.msra.mxu1 %vm157_vm2, %v2197_v1 }
0x11aa   :  { %4580 = vmatprep.subr.mxu1 %v4929_v8 }
0x11ac   :  { %4578 = vmatmul.mubr.msk.f32.vlgmr.msra.gmra.mrb[26].mxu1 %vm157_vm2, %v5317_v0 }
0x11ad   :  { %4581 = vmatpush3.xpose.msk.msra.mxu1 %vm157_vm2, %v2274_v2  ;;  %4582 = vmatprep.mubr.msk.f32.mxu1 %vm4930_vm1, %v4929_v8 }
0x11ae   :  { %4590 = vmatprep.subr.mxu1 %v4929_v8 }
0x11b0   :  { %4583 = vmatmul.mubr.msk.f32.vlgmr.msra.gmra.mrb[28].mxu1 %vm157_vm2, %v5315_v62 }
0x11b1   :  { %4592 = vmatprep.mubr.msk.f32.mxu1 %vm4930_vm1, %v4929_v8 }
0x127f   :  { %v2268_v3 = vpop.f32.mrb[26].mxu1 }
0x1280   :  { %v4579_v4 = vpop.f32.mrb[27].mxu1  ;;  %v2349_v17 = vsel %vm157_vm2, %v2268_v3, -inf }
0x1283   :  { %v2345_v6 = vpop.f32.mrb[28].mxu1 }
0x1284   :  { %v4584_v9 = vpop.f32.mrb[29].mxu1  ;;  %v2352_v10 = vsel %vm157_vm2, %v2345_v6, -inf }
0x1285   :  { %2353 = vmax.xlane.f32.xlu1 %v2352_v10 }
0x1296   :  { %2605 = vrot.lane.b32.xlu1 %v5315_v62, %s4934_s17 }
0x129a   :  { %2603 = vrot.lane.b32.xlu1 %v5315_v62, %s4933_s16 }
0x1312   :  { %v2354_v11 = vpop.xlane.xlu1 %2353 }
0x1313   :  { %v2356_v14 = vsub.f32 %v2345_v6, %v2354_v11 }
0x1315   :  { %v2359_v15 = vmul.f32 1.442695, %v2356_v14 }
0x1316   :  { %v2606_v21 = vpop.permute.xlu1 %2605 }
0x1317   :  { %4838 = vpow2.f32 %v2359_v15 }
0x131a   :  { %v2604_v23 = vpop.permute.xlu1 %2603 }
0x1321   :  { %v4839_v16 = vpop.eup %4838 }
0x1322   :  { %v2364_v12 = vsel %vm157_vm2, %v4839_v16, 0.0 }
0x1323   :  { %2365 = vadd.xlane.f32.xlu0 %v2364_v12  ;;  %v4238_v12 = vld [vmem:[%s5564_s3 + $0x28] sm:$0xff] }
0x1339   :  { %2447 = vrot.lane.b32.xlu0 %v5315_v62, %s4932_s15 }
0x1358   :  { %2350 = vmax.xlane.f32.xlu0 %v2349_v17  ;;  %v4231_v17 = vld [vmem:[%s5564_s3 + $0x20] sm:$0xff] }
0x136e   :  { %2371 = vrot.lane.b32.xlu0 %v5317_v0, %s4932_s15 }
0x1372   :  { %2525 = vrot.lane.b32.xlu0 %v5317_v0, %s4933_s16 }
0x13b0   :  { %v2366_v18 = vpop.xlane.xlu0 %2365 }
0x13b1   :  { %4840 = vrcp.f32 %v2366_v18 }
0x13b4   :  { %v2448_v19 = vpop.permute.xlu0 %2447 }
0x13b5   :  { %4591 = vmatpush3.msra.mxu1 %v2448_v19 }
0x13b6   :  { %4600 = vmatprep.subr.mxu1 %v4929_v8 }
0x13bb   :  { %v4841_v20 = vpop.eup %4840 }
0x13bc   :  { %v2370_v22 = vmul.f32 %v4841_v20, %v4839_v16 }
0x13be   :  { %4593 = vmatmul.mubr.msk.f32.vlgmr.msra.gmra.mrb[30].mxu1 %vm157_vm2, %v2370_v22 }
0x13bf   :  { %4601 = vmatpush3.xpose.msk.msra.mxu1 %vm157_vm2, %v2606_v21  ;;  %4602 = vmatprep.mubr.msk.f32.mxu1 %vm4930_vm1, %v4929_v8 }
0x13c0   :  { %4610 = vmatprep.subr.mxu1 %v4929_v8 }
0x13c2   :  { %4603 = vmatmul.mubr.msk.f32.vlgmr.msra.gmra.mrb[32].mxu1 %vm157_vm2, %v2604_v23 }
0x13c3   :  { %4612 = vmatprep.mubr.msk.f32.mxu1 %vm4930_vm1, %v4929_v8 }
0x13e5   :  { %v2351_v13 = vpop.xlane.xlu0 %2350 }
0x13e6   :  { %v2355_v24 = vsub.f32 %v2268_v3, %v2351_v13 }
0x13e8   :  { %v2357_v25 = vmul.f32 1.442695, %v2355_v24 }
0x13e9   :  { %v2372_v26 = vpop.permute.xlu0 %2371 }
0x13ea   :  { %4842 = vpow2.f32 %v2357_v25  ;;  %4586 = vmatpush3.msra.mxu0 %v2372_v26 }
0x13eb   :  { %4595 = vmatprep.subr.mxu0 %v4929_v8 }
0x13ed   :  { %v2526_v35 = vpop.permute.xlu0 %2525 }
0x13f4   :  { %v4843_v27 = vpop.eup %4842 }
0x13f5   :  { %v2361_v28 = vsel %vm157_vm2, %v4843_v27, 0.0 }
0x13f6   :  { %2362 = vadd.xlane.f32.xlu1 %v2361_v28 }
0x1407   :  { %2527 = vrot.lane.b32.xlu1 %v5317_v0, %s4934_s17 }
0x1483   :  { %v2363_v29 = vpop.xlane.xlu1 %2362 }
0x1484   :  { %4844 = vrcp.f32 %v2363_v29  ;;  %v4249_v29 = vld [vmem:[%s5564_s3 + $0x30] sm:$0xff] }
0x1487   :  { %v2528_v32 = vpop.permute.xlu1 %2527 }
0x148e   :  { %v4845_v30 = vpop.eup %4844 }
0x148f   :  { %v2368_v31 = vmul.f32 %v4845_v30, %v4843_v27 }
0x1491   :  { %4588 = vmatmul.mubr.msk.f32.vlgmr.msra.gmra.mrb[16].mxu0 %vm157_vm2, %v2368_v31  ;;  %v5362_v33 = vpop.f32.mrb[30].mxu1 }
0x1492   :  { %4596 = vmatpush3.xpose.msk.msra.mxu0 %vm157_vm2, %v2528_v32  ;;  %v4594_v34 = vpop.f32.mrb[31].mxu1  ;;  %4597 = vmatprep.mubr.msk.f32.mxu0 %vm4930_vm1, %v4929_v8 }
0x1493   :  { %4605 = vmatprep.subr.mxu0 %v4929_v8 }
0x1495   :  { %4598 = vmatmul.mubr.msk.f32.vlgmr.msra.gmra.mrb[18].mxu0 %vm157_vm2, %v2526_v35  ;;  %v2677_v36 = vpop.f32.mrb[32].mxu1 }
0x1496   :  { %v4604_v37 = vpop.f32.mrb[33].mxu1  ;;  %v2684_v38 = vsel %vm157_vm2, %v2677_v36, -inf  ;;  %4607 = vmatprep.mubr.msk.f32.mxu0 %vm4930_vm1, %v4929_v8 }
0x1497   :  { %2685 = vmax.xlane.f32.xlu1 %v2684_v38 }
0x14a8   :  { %3021 = vrot.lane.b32.xlu1 %v5317_v0, %s4935_s20 }
0x14ac   :  { %3019 = vrot.lane.b32.xlu1 %v5317_v0, %s4937_s22 }
0x14b0   :  { %3097 = vrot.lane.b32.xlu1 %v5315_v62, %s4937_s22 }
0x1524   :  { %v2686_v39 = vpop.xlane.xlu1 %2685 }
0x1525   :  { %v2688_v40 = vsub.f32 %v2677_v36, %v2686_v39 }
0x1527   :  { %v2691_v41 = vmul.f32 1.442695, %v2688_v40 }
0x1528   :  { %v3022_v49 = vpop.permute.xlu1 %3021 }
0x1529   :  { %4846 = vpow2.f32 %v2691_v41 }
0x152c   :  { %v3020_v52 = vpop.permute.xlu1 %3019 }
0x1530   :  { %v3098_v54 = vpop.permute.xlu1 %3097 }
0x1533   :  { %v4847_v7 = vpop.eup %4846 }
0x1534   :  { %v2696_v5 = vsel %vm157_vm2, %v4847_v7, 0.0 }
0x1535   :  { %2697 = vadd.xlane.f32.xlu0 %v2696_v5 }
0x154b   :  { %2779 = vrot.lane.b32.xlu0 %v5315_v62, %s4936_s21 }
0x154f   :  { %3099 = vrot.lane.b32.xlu0 %v5315_v62, %s4935_s20 }
0x1564   :  { %v5383_v42 = vpop.f32.mrb[16].mxu0 }
0x1565   :  { %v4589_v43 = vpop.f32.mrb[17].mxu0 }
0x1568   :  { %v2599_v44 = vpop.f32.mrb[18].mxu0 }
0x1569   :  { %v4599_v45 = vpop.f32.mrb[19].mxu0  ;;  %v2681_v46 = vsel %vm157_vm2, %v2599_v44, -inf }
0x156e   :  { %2682 = vmax.xlane.f32.xlu0 %v2681_v46 }
0x1584   :  { %2703 = vrot.lane.b32.xlu0 %v5317_v0, %s4936_s21 }
0x1588   :  { %3197 = vrot.lane.b32.xlu0 %v5317_v0, %s4938_s23 }
0x158c   :  { %3436 = vrot.lane.b32.xlu0 %v5317_v0, %s5583_s2 }
0x1590   :  { %3514 = vrot.lane.b32.xlu0 %v5315_v62, %s5583_s2  ;;  %s4156_s2 = sshll.u32 %s4942_s18, 4  ;;  %s4157_s2 = int_to_ptr.vmem [resolvable:$true] %s4156_s2 }
0x1591   :  { %p4905_p9 = scmp.lt.s32.totalorder %s4157_s2, %s4157_s2 }
0x1594   :  { %3434 = vrot.lane.b32.xlu0 %v5317_v0, %s5584_s14 }
0x1598   :  { %3512 = vrot.lane.b32.xlu0 %v5315_v62, %s5584_s14  ;;  %s4900_s14 = scalar_lea.vmem %s4157_s2, 256 }
0x1599   :  { %p4901_p8 = scmp.ne.s32.totalorder %s4157_s2, %s4900_s14  ;;  %p4906_p10 = scmp.lt.s32.totalorder %s4900_s14, %s4900_s14 }
0x159b   :  { %p4907_p11 = por %p4906_p10, %p4905_p9 }
0x159d   :  { %p4908_p12 = pnand %p4907_p11, %p4901_p8 }
0x15c2   :  { %v2698_v47 = vpop.xlane.xlu0 %2697 }
0x15c3   :  { %4848 = vrcp.f32 %v2698_v47 }
0x15c6   :  { %v2780_v48 = vpop.permute.xlu0 %2779 }
0x15c7   :  { %4611 = vmatpush3.msra.mxu1 %v2780_v48 }
0x15c8   :  { %4625 = vmatprep.subr.mxu1 %v4929_v8 }
0x15ca   :  { %v3100_v53 = vpop.permute.xlu0 %3099 }
0x15cd   :  { %v4849_v50 = vpop.eup %4848 }
0x15ce   :  { %v2702_v51 = vmul.f32 %v4849_v50, %v4847_v7 }
0x15d0   :  { %4613 = vmatmul.mubr.msk.f32.vlgmr.msra.gmra.mrb[34].mxu1 %vm157_vm2, %v2702_v51 }
0x15d1   :  { %4626 = vmatpush3.xpose.msk.msra.mxu1 %vm157_vm2, %v3022_v49  ;;  %4627 = vmatprep.mubr.msk.f32.mxu1 %vm4930_vm1, %v4929_v8 }
0x15d2   :  { %4630 = vmatprep.subr.mxu1 %v4929_v8 }
0x15d4   :  { %4628 = vmatmul.mubr.msk.f32.vlgmr.msra.gmra.mrb[36].mxu1 %vm157_vm2, %v3020_v52 }
0x15d5   :  { %4631 = vmatpush3.xpose.msk.msra.mxu1 %vm157_vm2, %v3100_v53  ;;  %4632 = vmatprep.mubr.msk.f32.mxu1 %vm4930_vm1, %v4929_v8 }
0x15d6   :  { %4640 = vmatprep.subr.mxu1 %v4929_v8 }
0x15d8   :  { %4633 = vmatmul.mubr.msk.f32.vlgmr.msra.gmra.mrb[38].mxu1 %vm157_vm2, %v3098_v54 }
0x15d9   :  { %4642 = vmatprep.mubr.msk.f32.mxu1 %vm4930_vm1, %v4929_v8 }
0x15fb   :  { %v2683_v55 = vpop.xlane.xlu0 %2682 }
0x15fc   :  { %v2687_v56 = vsub.f32 %v2599_v44, %v2683_v55 }
0x15fe   :  { %v2689_v57 = vmul.f32 1.442695, %v2687_v56 }
0x15ff   :  { %v2704_v60 = vpop.permute.xlu0 %2703 }
0x1600   :  { %4850 = vpow2.f32 %v2689_v57  ;;  %4606 = vmatpush3.msra.mxu0 %v2704_v60 }
0x1601   :  { %4615 = vmatprep.subr.mxu0 %v4238_v12 }
0x1603   :  { %v3198_v30 = vpop.permute.xlu0 %3197 }
0x1607   :  { %v3437_v35 = vpop.permute.xlu0 %3436 }
0x160a   :  { %v4851_v61 = vpop.eup %4850 }
0x160b   :  { %v2693_v63 = vsel %vm157_vm2, %v4851_v61, 0.0 }
0x160c   :  { %2694 = vadd.xlane.f32.xlu1 %v2693_v63 }
0x1699   :  { %v2695_v1 = vpop.xlane.xlu1 %2694 }
0x169a   :  { %4852 = vrcp.f32 %v2695_v1 }
0x16a3   :  { %v2851_v2 = vpop.f32.mrb[34].mxu1 }
0x16a4   :  { %v4853_v3 = vpop.eup %4852  ;;  %v4614_v4 = vpop.f32.mrb[35].mxu1 }
0x16a5   :  { %v2700_v6 = vmul.f32 %v4853_v3, %v4851_v61  ;;  %v4258_v3 = vld [vmem:[%s5564_s3 + $0x38] sm:$0xff] }
0x16a7   :  { %4608 = vmatmul.mubr.msk.f32.vlgmr.msra.gmra.mrb[20].mxu0 %vm157_vm2, %v2700_v6  ;;  %v3093_v9 = vpop.f32.mrb[36].mxu1 }
0x16a8   :  { %v4629_v10 = vpop.f32.mrb[37].mxu1  ;;  %v3175_v11 = vsel %vm157_vm2, %v3093_v9, -inf  ;;  %4616 = vmatpush3.msra.mxu0 %v4238_v12 }
0x16a9   :  { %3176 = vmax.xlane.f32.xlu1 %v3175_v11  ;;  %4620 = vmatprep.subr.mxu0 %v4231_v17 }
0x16ab   :  { %v3171_v14 = vpop.f32.mrb[38].mxu1 }
0x16ac   :  { %v4634_v15 = vpop.f32.mrb[39].mxu1  ;;  %v3178_v16 = vsel %vm157_vm2, %v3171_v14, -inf }
0x16ad   :  { %3179 = vmax.xlane.f32.xlu1 %v3178_v16  ;;  %v4262_v15 = vld [vmem:[%s5565_s4 + $0x1] ss:$0 sm:$0xff] }
0x1736   :  { %v3177_v18 = vpop.xlane.xlu1 %3176 }
0x1737   :  { %v3181_v19 = vsub.f32 %v3093_v9, %v3177_v18 }
0x1739   :  { %v3183_v20 = vmul.f32 1.442695, %v3181_v19 }
0x173a   :  { %v3180_v21 = vpop.xlane.xlu1 %3179 }
0x173b   :  { %4854 = vpow2.f32 %v3183_v20  ;;  %v3182_v22 = vsub.f32 %v3171_v14, %v3180_v21 }
0x173d   :  { %v3185_v23 = vmul.f32 1.442695, %v3182_v22 }
0x173f   :  { %4856 = vpow2.f32 %v3185_v23 }
0x1745   :  { %v4855_v13 = vpop.eup %4854 }
0x1746   :  { %v3187_v24 = vsel %vm157_vm2, %v4855_v13, 0.0 }
0x1747   :  { %3188 = vadd.xlane.f32.xlu1 %v3187_v24 }
0x1749   :  { %v4857_v25 = vpop.eup %4856 }
0x174a   :  { %v3190_v26 = vsel %vm157_vm2, %v4857_v25, 0.0 }
0x174b   :  { %3191 = vadd.xlane.f32.xlu1 %v3190_v26 }
0x175c   :  { %3273 = vrot.lane.b32.xlu1 %v5315_v62, %s4938_s23  ;;  %s5585_s23 = smov 40  }
0x177a   :  { %v2775_v27 = vpop.f32.mrb[20].mxu0 }
0x177b   :  { %v4609_v28 = vpop.f32.mrb[21].mxu0  ;;  %4617 = vmatprep.mubr.msk.f32.mxu0 %vm157_vm2, %v2775_v27 }
0x177c   :  { %4618 = vmatmul.mubr.msk.f32.vlgmr.msra.gmra.mrb[22].mxu0 %vm157_vm2, %v2851_v2 }
0x177d   :  { %4622 = vmatprep.mubr.msk.f32.mxu0 %vm157_vm2, %v5383_v42  ;;  %4621 = vmatpush3.msra.mxu0 %v4231_v17 }
0x177e   :  { %4635 = vmatprep.subr.mxu0 %v4929_v8 }
0x1784   :  { %4623 = vmatmul.mubr.msk.f32.vlgmr.msra.gmra.mrb[22].mxu0 %vm157_vm2, %v5362_v33  ;;  %v3515_v33 = vpop.permute.xlu0 %3514 }
0x1785   :  { %4636 = vmatpush3.msra.mxu0 %v3198_v30  ;;  %4637 = vmatprep.mubr.msk.f32.mxu0 %vm4930_vm1, %v4929_v8 }
0x1786   :  { %4645 = vmatprep.subr.mxu0 %v4249_v29 }
0x1788   :  { %v3435_v40 = vpop.permute.xlu0 %3434 }
0x178c   :  { %v3513_v43 = vpop.permute.xlu0 %3512 }
0x17d4   :  { %v3189_v31 = vpop.xlane.xlu1 %3188 }
0x17d5   :  { %4858 = vrcp.f32 %v3189_v31  ;;  %v4268_v31 = vld [vmem:[%s5570_s9 + $0x28] sm:$0xff] }
0x17d8   :  { %v3192_v32 = vpop.xlane.xlu1 %3191 }
0x17d9   :  { %4860 = vrcp.f32 %v3192_v32 }
0x17dc   :  { %v3274_v34 = vpop.permute.xlu1 %3273 }
0x17dd   :  { %4641 = vmatpush3.msra.mxu1 %v3274_v34  ;;  %v4269_v34 = vld [vmem:[%s5570_s9 + $0x30] sm:$0xff] }
0x17de   :  { %4650 = vmatprep.subr.mxu1 %v4929_v8 }
0x17df   :  { %v4859_v36 = vpop.eup %4858 }
0x17e0   :  { %v3194_v37 = vmul.f32 %v4859_v36, %v4855_v13 }
0x17e2   :  { %4638 = vmatmul.mubr.msk.f32.vlgmr.msra.gmra.mrb[24].mxu0 %vm157_vm2, %v3194_v37  ;;  %v4275_v37 = vld [vmem:[%s5572_s11 + $0x40] sm:$0xff] }
0x17e3   :  { %v4861_v38 = vpop.eup %4860  ;;  %4646 = vmatpush3.msra.mxu0 %v4249_v29 }
0x17e4   :  { %v3196_v39 = vmul.f32 %v4861_v38, %v4857_v25  ;;  %4655 = vmatprep.subr.mxu0 %v4929_v8  ;;  %v4276_v38 = vld [vmem:[%s5572_s11 + $0x48] sm:$0xff] }
0x17e6   :  { %4643 = vmatmul.mubr.msk.f32.vlgmr.msra.gmra.mrb[40].mxu1 %vm157_vm2, %v3196_v39  ;;  %v4753_v39 = vpack.c.bf16 %v4276_v38, %v4275_v37  ;;  %v4290_v38 = vld [vmem:[%s5569_s8 + $0x1] ss:$0 sm:$0xff] }
0x17e7   :  { %4651 = vmatpush3.xpose.msk.msra.mxu1 %vm157_vm2, %v3437_v35  ;;  %4652 = vmatprep.mubr.msk.f32.mxu1 %vm4930_vm1, %v4929_v8  ;;  %v4270_v35 = vld [vmem:[%s5570_s9 + $0x38] sm:$0xff] }
0x17e8   :  { %4660 = vmatprep.subr.mxu1 %v4929_v8  ;;  %v4749_v36 = vpack.c.bf16 %v4270_v35, %v4269_v34  ;;  %v4289_v34 = vld [vmem:[%s5568_s7 + $0x1] ss:$0 sm:$0xff] }
0x17ea   :  { %4653 = vmatmul.mubr.msk.f32.vlgmr.msra.gmra.mrb[42].mxu1 %vm157_vm2, %v3435_v40  ;;  %v4278_v40 = vld [vmem:[%s5572_s11 + $0x58] sm:$0xff] }
0x17eb   :  { %4662 = vmatprep.mubr.msk.f32.mxu1 %vm4930_vm1, %v4929_v8 }
0x18b5   :  { %v3269_v41 = vpop.f32.mrb[24].mxu0 }
0x18b6   :  { %v4639_v7 = vpop.f32.mrb[25].mxu0  ;;  %4647 = vmatprep.mubr.msk.f32.mxu0 %vm157_vm2, %v3269_v41 }
0x18b7   :  { %v4279_v7 = vld [vmem:[%s5572_s11 + $0x60] sm:$0xff] }
0x18b9   :  { %v3345_v5 = vpop.f32.mrb[40].mxu1 }
0x18ba   :  { %v4644_v42 = vpop.f32.mrb[41].mxu1  ;;  %4648 = vmatmul.mubr.msk.f32.vlgmr.msra.gmra.mrb[22].mxu0 %vm157_vm2, %v3345_v5  ;;  %v4280_v5 = vld [vmem:[%s5572_s11 + $0x68] sm:$0xff] }
0x18bb   :  { %4656 = vmatpush3.xpose.msk.msra.mxu0 %vm157_vm2, %v3515_v33  ;;  %4657 = vmatprep.mubr.msk.f32.mxu0 %vm4930_vm1, %v4929_v8  ;;  %v4277_v33 = vld [vmem:[%s5572_s11 + $0x50] sm:$0xff]  ;;  %v4761_v42 = vpack.c.bf16 %v4280_v5, %v4279_v7 }
0x18bc   :  { %4665 = vmatprep.subr.mxu0 %v4929_v8  ;;  %v4757_v41 = vpack.c.bf16 %v4278_v40, %v4277_v33 }
0x18bd   :  { %v3508_v44 = vpop.f32.mrb[42].mxu1 }
0x18be   :  { %v4654_v45 = vpop.f32.mrb[43].mxu1  ;;  %4658 = vmatmul.mubr.msk.f32.vlgmr.msra.gmra.mrb[26].mxu0 %vm157_vm2, %v3513_v43  ;;  %v3590_v46 = vsel %vm157_vm2, %v3508_v44, -inf }
0x18bf   :  { %3591 = vmax.xlane.f32.xlu1 %v3590_v46  ;;  %4667 = vmatprep.mubr.msk.f32.mxu0 %vm4930_vm1, %v4929_v8 }
0x194c   :  { %v3592_v47 = vpop.xlane.xlu1 %3591 }
0x194d   :  { %v3596_v48 = vsub.f32 %v3508_v44, %v3592_v47 }
0x194f   :  { %v3598_v49 = vmul.f32 1.442695, %v3596_v48 }
0x1951   :  { %4862 = vpow2.f32 %v3598_v49 }
0x195b   :  { %v4863_v53 = vpop.eup %4862 }
0x195c   :  { %v3602_v54 = vsel %vm157_vm2, %v4863_v53, 0.0 }
0x1991   :  { %v3586_v50 = vpop.f32.mrb[26].mxu0 }
0x1992   :  { %v4659_v51 = vpop.f32.mrb[27].mxu0  ;;  %v3593_v52 = vsel %vm157_vm2, %v3586_v50, -inf }
0x1993   :  { %3594 = vmax.xlane.f32.xlu0 %v3593_v52 }
0x1997   :  { %3603 = vadd.xlane.f32.xlu0 %v3602_v54  ;;  %v4266_v54 = vld [vmem:[%s5567_s6 + $0x1] ss:$0 sm:$0xff] }
0x19ad   :  { %3612 = vrot.lane.b32.xlu0 %v5317_v0, %s5585_s23 }
0x1a20   :  { %v3595_v55 = vpop.xlane.xlu0 %3594 }
0x1a21   :  { %v3597_v56 = vsub.f32 %v3586_v50, %v3595_v55  ;;  %v4265_v50 = vld [vmem:[%s5566_s5 + $0x1] ss:$0 sm:$0xff] }
0x1a23   :  { %v3600_v57 = vmul.f32 1.442695, %v3597_v56 }
0x1a24   :  { %v3604_v8 = vpop.xlane.xlu0 %3603 }
0x1a25   :  { %4864 = vpow2.f32 %v3600_v57 }
0x1a26   :  { %4866 = vrcp.f32 %v3604_v8 }
0x1a28   :  { %v3613_v60 = vpop.permute.xlu0 %3612 }
0x1a29   :  { %4661 = vmatpush3.msra.mxu1 %v3613_v60  ;;  %v4281_v60 = vld [vmem:[%s5572_s11 + $0x70] sm:$0xff] }
0x1a2f   :  { %v4865_v61 = vpop.eup %4864 }
0x1a30   :  { %v4867_v63 = vpop.eup %4866  ;;  %v3605_v1 = vsel %vm157_vm2, %v4865_v61, 0.0 }
0x1a31   :  { %v3609_v2 = vmul.f32 %v4867_v63, %v4863_v53  ;;  %3606 = vadd.xlane.f32.xlu1 %v3605_v1  ;;  %v4272_v1 = vld [vmem:[%s5571_s10 + $0x1] ss:$0 sm:$0xff] }
0x1a33   :  { %4663 = vmatmul.mubr.msk.f32.vlgmr.msra.gmra.mrb[44].mxu1 %vm157_vm2, %v3609_v2 }
0x1a42   :  { %3688 = vrot.lane.b32.xlu1 %v5315_v62, %s5585_s23 }
0x1abe   :  { %v3607_v0 = vpop.xlane.xlu1 %3606 }
0x1abf   :  { %4868 = vrcp.f32 %v3607_v0 }
0x1ac2   :  { %v3689_v4 = vpop.permute.xlu1 %3688 }
0x1ac3   :  { %4666 = vmatpush3.msra.mxu0 %v3689_v4 }
0x1ac4   :  { %4670 = vmatprep.subr.mxu0 %v4258_v3 }
0x1ac9   :  { %v4869_v6 = vpop.eup %4868 }
0x1aca   :  { %v3611_v9 = vmul.f32 %v4869_v6, %v4865_v61  ;;  %v4282_v61 = vld [vmem:[%s5572_s11 + $0x78] sm:$0xff] }
0x1acb   :  { %v4765_v63 = vpack.c.bf16 %v4282_v61, %v4281_v60 }
0x1acc   :  { %4668 = vmatmul.mubr.msk.f32.vlgmr.msra.gmra.mrb[28].mxu0 %vm157_vm2, %v3611_v9 }
0x1acd   :  { %4671 = vmatpush3.msra.mxu0 %v4258_v3 }
0x1ace   :  { %4754 = vmatprep.subr.bf16.mxu0 %v4753_v39 }
0x1b06   :  { %v3684_v10 = vpop.f32.mrb[44].mxu1 }
0x1b07   :  { %v4664_v11 = vpop.f32.mrb[45].mxu1  ;;  %4672 = vmatprep.mubr.msk.f32.mxu0 %vm157_vm2, %v3684_v10  ;;  %v4284_v10 = vld [vmem:[%s5573_s12 + $0x1] ss:$0 sm:$0xff] }
0x1b9f   :  { %v3760_v14 = vpop.f32.mrb[28].mxu0 }
0x1ba0   :  { %v4669_v62 = vpop.f32.mrb[29].mxu0  ;;  %4673 = vmatmul.mubr.msk.f32.vlgmr.msra.gmra.mrb[22].mxu0 %vm157_vm2, %v3760_v14 }
0x1ba1   :  { %4756 = vmatpush3.bf16.msra.mxu0 %v4753_v39 }
0x1ba2   :  { %4758 = vmatprep.subr.bf16.mxu0 %v4757_v41 }
0x1ba5   :  { %4760 = vmatpush3.bf16.msra.mxu0 %v4757_v41 }
0x1ba6   :  { %4762 = vmatprep.subr.bf16.mxu0 %v4761_v42 }
0x1ba9   :  { %4764 = vmatpush3.bf16.msra.mxu0 %v4761_v42 }
0x1baa   :  { %4766 = vmatprep.subr.bf16.mxu0 %v4765_v63 }
0x1bad   :  { %4768 = vmatpush3.bf16.msra.mxu0 %v4765_v63 }
0x1c73   :  { %v4674_v16 = vpop.f32.mrb[22].mxu0 }
0x1c74   :  { %v3858_v12 = vadd.f32 %v4674_v16, %v4262_v15  ;;  %v3838_v17 = vpop.f32.mrb[23].mxu0 }
0x1c75   :  { %v3857_v18 = vadd.f32 %v4262_v15, %v3838_v17 }
0x1c76   :  { %v3860_v19 = vadd.f32 %v3858_v12, %v5304_v59 }
0x1c77   :  { %v3859_v20 = vadd.f32 %v3857_v18, %v5302_v58  ;;  %v4267_v58 = vld [vmem:[%s5570_s9 + $0x20] sm:$0xff] }
0x1c78   :  { %v3868_v21 = vsel %vm72_vm0, %v3860_v19, 0.0  ;;  %v4745_v32 = vpack.c.bf16 %v4268_v31, %v4267_v58 }
0x1c79   :  { %3869 = vadd.xlane.f32.xlu0 %v3868_v21  ;;  %v3865_v22 = vsel %vm72_vm0, %v3859_v20, 0.0 }
0x1c7a   :  { %3866 = vadd.xlane.f32.xlu1 %v3865_v22  ;;  %4746 = vmatprep.subr.bf16.mxu1 %v4745_v32 }
0x1c7b   :  { %4748 = vmatpush3.bf16.msra.mxu1 %v4745_v32 }
0x1c7c   :  { %4750 = vmatprep.subr.bf16.mxu1 %v4749_v36 }
0x1c7f   :  { %4752 = vmatpush3.bf16.msra.mxu1 %v4749_v36 }
0x1d06   :  { %v3870_v23 = vpop.xlane.xlu0 %3869 }
0x1d07   :  { %v3872_v13 = vmul.f32 0.03125, %v3870_v23  ;;  %v3867_v24 = vpop.xlane.xlu1 %3866 }
0x1d08   :  { %v3871_v25 = vmul.f32 0.03125, %v3867_v24 }
0x1d09   :  { %v3874_v26 = vsub.f32 %v3860_v19, %v3872_v13 }
0x1d0a   :  { %v3873_v27 = vsub.f32 %v3859_v20, %v3871_v25 }
0x1d0b   :  { %v3876_v28 = vmul.f32 %v3874_v26, %v3874_v26 }
0x1d0c   :  { %v3875_v29 = vmul.f32 %v3873_v27, %v3873_v27 }
0x1d0d   :  { %v3880_v30 = vsel %vm72_vm0, %v3876_v28, 0.0 }
0x1d0e   :  { %3881 = vadd.xlane.f32.xlu1 %v3880_v30  ;;  %v3877_v59 = vsel %vm72_vm0, %v3875_v29, 0.0 }
0x1d0f   :  { %3878 = vadd.xlane.f32.xlu0 %v3877_v59 }
0x1d9b   :  { %v3882_v43 = vpop.xlane.xlu1 %3881 }
0x1d9c   :  { %v3884_v44 = vmul.f32 0.03125, %v3882_v43  ;;  %v3879_v45 = vpop.xlane.xlu0 %3878 }
0x1d9d   :  { %v3883_v46 = vmul.f32 0.03125, %v3879_v45 }
0x1d9e   :  { %v3886_v47 = vadd.f32 1e-05, %v3884_v44 }
0x1d9f   :  { %v3885_v48 = vadd.f32 1e-05, %v3883_v46 }
0x1da0   :  { %4870 = vrsqrt.f32 %v3886_v47 }
0x1da1   :  { %4872 = vrsqrt.f32 %v3885_v48 }
0x1daa   :  { %v4871_v49 = vpop.eup %4870 }
0x1dab   :  { %v4873_v51 = vpop.eup %4872  ;;  %v3890_v52 = vmul.f32 %v4871_v49, %v3874_v26 }
0x1dac   :  { %v3889_v53 = vmul.f32 %v4873_v51, %v3873_v27 }
0x1dad   :  { %v3898_v55 = vmul.f32 %v4265_v50, %v3890_v52 }
0x1dae   :  { %v3897_v56 = vmul.f32 %v4265_v50, %v3889_v53 }
0x1daf   :  { %v3906_v8 = vadd.f32 %v4266_v54, %v3898_v55 }
0x1db0   :  { %v3905_v57 = vadd.f32 %v4266_v54, %v3897_v56 }
0x1db2   :  { %4683 = vmatprep.mubr.msk.f32.mxu1 %vm72_vm0, %v3905_v57 }
0x1db3   :  { %4684 = vmatmul.mubr.msk.f32.vlgmr.msra.gmra.mrb[46].mxu1 %vm72_vm0, %v3906_v8 }
0x1e86   :  { %v4685_v2 = vpop.f32.mrb[46].mxu1 }
0x1e87   :  { %v3998_v0 = vadd.f32 %v4685_v2, %v4272_v1  ;;  %v3992_v3 = vpop.f32.mrb[47].mxu1 }
0x1e88   :  { %v3993_v4 = vadd.f32 %v4272_v1, %v3992_v3 }
0x1e89   :  { %v4002_v9 = vmax.f32 %v3998_v0, 0.0 }
0x1e8a   :  { %v4001_v6 = vmax.f32 %v3993_v4, 0.0 }
0x1e8c   :  { %4702 = vmatprep.mubr.msk.f32.mxu0 %vm1973_vm3, %v4001_v6 }
0x1e8d   :  { %4703 = vmatmul.mubr.msk.f32.vlgmr.msra.gmra.mrb[30].mxu0 %vm1973_vm3, %v4002_v9 }
0x1f60   :  { %v4704_v11 = vpop.f32.mrb[30].mxu0 }
0x1f61   :  { %v4098_v14 = vadd.f32 %v4704_v11, %v4284_v10  ;;  %v4092_v62 = vpop.f32.mrb[31].mxu0 }
0x1f62   :  { %v4093_v15 = vadd.f32 %v4284_v10, %v4092_v62 }
0x1f63   :  { %v4102_v16 = vadd.f32 %v4098_v14, %v3906_v8 }
0x1f64   :  { %v4101_v12 = vadd.f32 %v4093_v15, %v3905_v57 }
0x1f65   :  { %v4110_v17 = vsel %vm72_vm0, %v4102_v16, 0.0 }
0x1f66   :  { %4111 = vadd.xlane.f32.xlu1 %v4110_v17  ;;  %v4107_v18 = vsel %vm72_vm0, %v4101_v12, 0.0 }
0x1f67   :  { %4108 = vadd.xlane.f32.xlu0 %v4107_v18 }
0x1ff3   :  { %v4112_v19 = vpop.xlane.xlu1 %4111 }
0x1ff4   :  { %v4114_v20 = vmul.f32 0.03125, %v4112_v19  ;;  %v4109_v21 = vpop.xlane.xlu0 %4108 }
0x1ff5   :  { %v4113_v22 = vmul.f32 0.03125, %v4109_v21 }
0x1ff6   :  { %v4116_v23 = vsub.f32 %v4102_v16, %v4114_v20 }
0x1ff7   :  { %v4115_v13 = vsub.f32 %v4101_v12, %v4113_v22 }
0x1ff8   :  { %v4118_v24 = vmul.f32 %v4116_v23, %v4116_v23 }
0x1ff9   :  { %v4117_v25 = vmul.f32 %v4115_v13, %v4115_v13 }
0x1ffa   :  { %v4122_v26 = vsel %vm72_vm0, %v4118_v24, 0.0 }
0x1ffb   :  { %4123 = vadd.xlane.f32.xlu1 %v4122_v26  ;;  %v4119_v27 = vsel %vm72_vm0, %v4117_v25, 0.0 }
0x1ffc   :  { %4120 = vadd.xlane.f32.xlu0 %v4119_v27 }
0x2088   :  { %v4124_v28 = vpop.xlane.xlu1 %4123 }
0x2089   :  { %v4126_v29 = vmul.f32 0.03125, %v4124_v28  ;;  %v4121_v30 = vpop.xlane.xlu0 %4120 }
0x208a   :  { %v4125_v59 = vmul.f32 0.03125, %v4121_v30 }
0x208b   :  { %v4128_v58 = vadd.f32 1e-05, %v4126_v29 }
0x208c   :  { %v4127_v31 = vadd.f32 1e-05, %v4125_v59 }
0x208d   :  { %4874 = vrsqrt.f32 %v4128_v58 }
0x208e   :  { %4876 = vrsqrt.f32 %v4127_v31 }
0x2097   :  { %v4875_v32 = vpop.eup %4874 }
0x2098   :  { %v4877_v35 = vpop.eup %4876  ;;  %v4132_v36 = vmul.f32 %v4875_v32, %v4116_v23 }
0x2099   :  { %v4131_v37 = vmul.f32 %v4877_v35, %v4115_v13 }
0x209a   :  { %v4140_v33 = vmul.f32 %v4289_v34, %v4132_v36 }
0x209b   :  { %v4139_v39 = vmul.f32 %v4289_v34, %v4131_v37 }
0x209c   :  { %v4148_v40 = vadd.f32 %v4290_v38, %v4140_v33 }
0x209d   :  { %v4147_v41 = vadd.f32 %v4290_v38, %v4139_v39 }
0x209e   :  { %4150 = vst.msk [vmem:[#allocation5 + $0x8] sm:$0xff] %vm72_vm0, %v4148_v40 }
0x209f   :  { %4149 = vst.msk [vmem:[#allocation5] sm:$0xff] %vm72_vm0, %v4147_v41 }
0x20a0   :  { %4911 = shalt.err (!%p4908_p12)
}
0x20a1   :  { %s4912_s15 = scalar_lea.hbm %s5574_s13, 256 }
0x20a2   :  { %p4913_p13 = scmp.ne.s32.totalorder %s5574_s13, %s4912_s15  ;;  %p4916_p0 = scmp.lt.u32.totalorder %s4912_s15, %s5574_s13 }
0x20a4   :  { %p4918_p1 = pnand %p4916_p0, %p4913_p13 }
0x20a6   :  { %4921 = shalt.err (!%p4918_p1)
}
0x20a7   :  { %s5586_s21 = smov 8   ;;  %s5587_s22 = smov 128  }
0x20a8   :  { %4162 = dma.vmem_to_hbm [thread:$0]  %s4157_s2, 256, %s5574_s13, [#allocation4], %s5587_s22, %s5587_s22, %s5586_s21  }
0x20a9   :  { %4924 = dma.done.wait [#allocation4], 256  }
0x20aa   :  { %4925 = vsyncadd [#allocation4], 4294967040 }
0x20ab   :  { %4166 = vsyncpa [#allocation3], 1 }
0x20ac   :  { %4167 = vsyncpa [#allocation4], 1 }

</bundles_post_ra>
